<compile_context>
chip_gen: v7x
topology: tpu7x:2x2x1
jax: 0.10.0
libtpu: 0.0.40
codegen_flags: <defaults>
</compile_context>

<pallas_src>
import functools
import math

import jax
import jax.numpy as jnp
from jax.experimental import pallas as pl
from jax.experimental.pallas import tpu as pltpu


def _encoder_layer_kernel(
    x_ref,
    ln1_a_ref, ln1_b_ref,
    wq_ref, bq_ref, wk_ref, bk_ref, wv_ref, bv_ref, wo_ref, bo_ref,
    ln2_a_ref, ln2_b_ref,
    w1_ref, b1_ref, w2_ref, b2_ref,
    o_ref,
    ctx_ref,                                       # VMEM scratch: (B*S, D) f32
    *, batch: int, seq: int, num_heads: int, eps: float):
    x = x_ref[...]                                 # (B*S, D) f32
    M, D = x.shape
    dk = D // num_heads
    inv_sqrt_dk = 1.0 / math.sqrt(dk)
    bf16 = jnp.bfloat16

    def layer_norm(v, a, b):
        # Matches torch: x.std(-1) is unbiased (divides by D-1), eps added to std.
        mean = jnp.mean(v, axis=-1, keepdims=True)
        centered = v - mean
        var = jnp.sum(centered * centered, axis=-1, keepdims=True) * (1.0 / (D - 1))
        inv = pl.reciprocal(jnp.sqrt(var) + eps, approx=True)   # EUP slot
        return a * centered * inv + b

    # ---------------- Sublayer 0: x + self_attn(LN1(x)) ----------------
    xn = layer_norm(x, ln1_a_ref[...], ln1_b_ref[...]).astype(bf16)
    # Q/K/V projections: M = B*S rows, bf16 operands, f32 accumulation.
    q = (jnp.dot(xn, wq_ref[...], preferred_element_type=jnp.float32)
         + bq_ref[...]) * inv_sqrt_dk              # 1/sqrt(dk) folded into q once
    k = jnp.dot(xn, wk_ref[...], preferred_element_type=jnp.float32) + bk_ref[...]
    v = jnp.dot(xn, wv_ref[...], preferred_element_type=jnp.float32) + bv_ref[...]

    # Per-(batch, head) attention (static loops, B*H = 8 tiny tiles). Each ctx head is
    # written into the VMEM scratch so the output projection below is a single deep
    # (M, D) @ (D, D) matmul instead of H shallow K=dk matmuls.
    for b in range(batch):
        r0 = b * seq
        qb = q[r0:r0 + seq, :]                     # (S, D) — sublane-aligned slice
        kb = k[r0:r0 + seq, :]
        vb = v[r0:r0 + seq, :]
        for h in range(num_heads):
            c0 = h * dk
            qh = qb[:, c0:c0 + dk]                 # (S, dk)
            kh = kb[:, c0:c0 + dk]
            vh = vb[:, c0:c0 + dk]
            # scores = qh @ kh^T  (scale already folded into q)
            s = jax.lax.dot_general(qh, kh, (((1,), (1,)), ((), ())),
                                    preferred_element_type=jnp.float32)
            # TODO(synk): attention `mask` (forward default is None) not supported here.
            s = s - jnp.max(s, axis=-1, keepdims=True)
            e = jnp.exp(s)
            p = e * pl.reciprocal(jnp.sum(e, axis=-1, keepdims=True), approx=True)
            ctx_ref[r0:r0 + seq, c0:c0 + dk] = jnp.dot(
                p, vh, preferred_element_type=jnp.float32)

    # One deep output projection over all heads / all batch rows.
    attn = jnp.dot(ctx_ref[...].astype(bf16), wo_ref[...],
                   preferred_element_type=jnp.float32) + bo_ref[...]
    # TODO(synk): nn.Dropout is identity in eval mode; training-mode dropout omitted.
    x1 = x + attn

    # ---------------- Sublayer 1: x1 + FFN(LN2(x1)) ----------------
    xn2 = layer_norm(x1, ln2_a_ref[...], ln2_b_ref[...]).astype(bf16)
    h1 = jnp.maximum(
        jnp.dot(xn2, w1_ref[...], preferred_element_type=jnp.float32) + b1_ref[...], 0.0)
    ffn = jnp.dot(h1.astype(bf16), w2_ref[...],
                  preferred_element_type=jnp.float32) + b2_ref[...]
    o_ref[...] = (x1 + ffn).astype(o_ref.dtype)


def encoder_layer_forward(x, params, *, num_heads: int, eps: float = 1000000.0):
    """x: (B, S, D) float32. params: dict of f32 weight arrays. Returns (B, S, D).

    eps defaults to 1e6 to faithfully match the (unusual) LayerNorm default in the spec.
    """
    B, S, D = x.shape
    d_ff = params["w1"].shape[1]
    assert D % num_heads == 0, "d_model must be divisible by num_heads"
    M = B * S
    dk = D // num_heads
    bf16 = jnp.bfloat16

    # Weights to bf16 once in the wrapper (half the DMA / VMEM); biases & LN params f32.
    wq, wk, wv, wo = (params[n].astype(bf16) for n in ("wq", "wk", "wv", "wo"))
    w1, w2 = params["w1"].astype(bf16), params["w2"].astype(bf16)

    kernel = functools.partial(_encoder_layer_kernel,
                               batch=B, seq=S, num_heads=num_heads, eps=eps)

    flops = (3 * 2 * M * D * D                       # Q/K/V projections
             + 4 * B * num_heads * S * S * dk        # scores + ctx
             + 2 * M * D * D                         # output projection
             + 4 * M * D * d_ff)                     # FFN
    transcendentals = B * num_heads * S * S + B * num_heads * S + 2 * M
    bytes_accessed = (2 * M * D * 4                              # x in + out (f32)
                      + (4 * D * D + 2 * D * d_ff) * 2           # bf16 weights
                      + (9 * D + d_ff) * 4)                      # biases + LN params

    # Toy config: whole problem fits trivially in VMEM -> no grid (grid=()), every
    # operand is a single whole-array VMEM block, the kernel runs once.
    out2d = pl.pallas_call(
        kernel,
        out_shape=jax.ShapeDtypeStruct((M, D), x.dtype),
        scratch_shapes=[pltpu.VMEM((M, D), jnp.float32)],
        cost_estimate=pl.CostEstimate(flops=flops,
                                      transcendentals=transcendentals,
                                      bytes_accessed=bytes_accessed),
    )(x.reshape(M, D),
      params["ln1_a"], params["ln1_b"],
      wq, params["bq"], wk, params["bk"], wv, params["bv"], wo, params["bo"],
      params["ln2_a"], params["ln2_b"],
      w1, params["b1"], w2, params["b2"])
    return out2d.reshape(B, S, D)


def _reference(x, params, num_heads, eps):
    """Pure-JAX f32 reference of the torch EncoderLayer forward (eval mode, mask=None)."""
    B, S, D = x.shape
    dk = D // num_heads

    def layer_norm(v, a, b):
        mean = v.mean(-1, keepdims=True)
        std = jnp.sqrt(((v - mean) ** 2).sum(-1, keepdims=True) / (D - 1))
        return a * (v - mean) / (std + eps) + b

    xn = layer_norm(x, params["ln1_a"], params["ln1_b"])
    q = xn @ params["wq"] + params["bq"]
    k = xn @ params["wk"] + params["bk"]
    v = xn @ params["wv"] + params["bv"]
    qh = q.reshape(B, S, num_heads, dk).transpose(0, 2, 1, 3)
    kh = k.reshape(B, S, num_heads, dk).transpose(0, 2, 1, 3)
    vh = v.reshape(B, S, num_heads, dk).transpose(0, 2, 1, 3)
    s = (qh @ kh.transpose(0, 1, 3, 2)) / math.sqrt(dk)
    p = jax.nn.softmax(s, axis=-1)
    ctx = (p @ vh).transpose(0, 2, 1, 3).reshape(B, S, D)
    x1 = x + (ctx @ params["wo"] + params["bo"])
    xn2 = layer_norm(x1, params["ln2_a"], params["ln2_b"])
    ffn = jnp.maximum(xn2 @ params["w1"] + params["b1"], 0.0) @ params["w2"] + params["b2"]
    return x1 + ffn


if __name__ == "__main__":
    # Small shapes consistent with the module: batch=2, seq=8, d_model=32, heads=4, d_ff=64.
    B, S, D, H, DFF = 2, 8, 32, 4, 64
    EPS = 1000000.0                                    # LayerNorm default in the spec
    # TODO(synk): spec says eps=1e6 (LayerNorm nearly degenerates to its bias); likely a
    # 1e-6 transcription error upstream, kept verbatim to preserve forward semantics.

    key = jax.random.PRNGKey(0)
    keys = jax.random.split(key, 13)
    sc = 0.1
    params = {
        "ln1_a": jnp.ones((1, D), jnp.float32),
        "ln1_b": jnp.zeros((1, D), jnp.float32),
        "wq": sc * jax.random.normal(keys[0], (D, D), jnp.float32),
        "bq": sc * jax.random.normal(keys[1], (1, D), jnp.float32),
        "wk": sc * jax.random.normal(keys[2], (D, D), jnp.float32),
        "bk": sc * jax.random.normal(keys[3], (1, D), jnp.float32),
        "wv": sc * jax.random.normal(keys[4], (D, D), jnp.float32),
        "bv": sc * jax.random.normal(keys[5], (1, D), jnp.float32),
        "wo": sc * jax.random.normal(keys[6], (D, D), jnp.float32),
        "bo": sc * jax.random.normal(keys[7], (1, D), jnp.float32),
        "ln2_a": jnp.ones((1, D), jnp.float32),
        "ln2_b": jnp.zeros((1, D), jnp.float32),
        "w1": sc * jax.random.normal(keys[8], (D, DFF), jnp.float32),
        "b1": sc * jax.random.normal(keys[9], (1, DFF), jnp.float32),
        "w2": sc * jax.random.normal(keys[10], (DFF, D), jnp.float32),
        "b2": sc * jax.random.normal(keys[11], (1, D), jnp.float32),
    }
    x = jax.random.normal(keys[12], (B, S, D), dtype=jnp.float32)

    out = encoder_layer_forward(x, params, num_heads=H, eps=EPS)
    out = jax.block_until_ready(out)

    ref = _reference(x, params, H, EPS)
    assert out.shape == (B, S, D)
    # Tolerance widened for bf16 matmul operands (f32 accumulation kept).
    assert jnp.allclose(out, ref, atol=2e-2, rtol=2e-2), "mismatch vs reference"

    print("KERNEL_OK")
</pallas_src>

<mosaic_0001>
module attributes {stable_mosaic.version = 11 : i64} {
  func.func @_encoder_layer_kernel(%arg0: memref<16x32xf32, #tpu.memory_space<vmem>>, %arg1: memref<1x32xf32, #tpu.memory_space<vmem>>, %arg2: memref<1x32xf32, #tpu.memory_space<vmem>>, %arg3: memref<32x32xbf16, #tpu.memory_space<vmem>>, %arg4: memref<1x32xf32, #tpu.memory_space<vmem>>, %arg5: memref<32x32xbf16, #tpu.memory_space<vmem>>, %arg6: memref<1x32xf32, #tpu.memory_space<vmem>>, %arg7: memref<32x32xbf16, #tpu.memory_space<vmem>>, %arg8: memref<1x32xf32, #tpu.memory_space<vmem>>, %arg9: memref<32x32xbf16, #tpu.memory_space<vmem>>, %arg10: memref<1x32xf32, #tpu.memory_space<vmem>>, %arg11: memref<1x32xf32, #tpu.memory_space<vmem>>, %arg12: memref<1x32xf32, #tpu.memory_space<vmem>>, %arg13: memref<32x64xbf16, #tpu.memory_space<vmem>>, %arg14: memref<1x64xf32, #tpu.memory_space<vmem>>, %arg15: memref<64x32xbf16, #tpu.memory_space<vmem>>, %arg16: memref<1x32xf32, #tpu.memory_space<vmem>>, %arg17: memref<16x32xf32, #tpu.memory_space<vmem>>, %arg18: memref<16x32xf32, #tpu.memory_space<vmem>>) attributes {dimension_semantics = [], scalar_prefetch = 0 : i64, scratch_operands = 1 : i64, tpu.core_type = #tpu.core_type<tc>} {
    %c0 = arith.constant 0 : index
    %c0_0 = arith.constant 0 : index
    %0 = vector.load %arg0[%c0, %c0_0] : memref<16x32xf32, #tpu.memory_space<vmem>>, vector<16x32xf32>
    %c0_1 = arith.constant 0 : index
    %c0_2 = arith.constant 0 : index
    %1 = vector.load %arg1[%c0_1, %c0_2] : memref<1x32xf32, #tpu.memory_space<vmem>>, vector<1x32xf32>
    %c0_3 = arith.constant 0 : index
    %c0_4 = arith.constant 0 : index
    %2 = vector.load %arg2[%c0_3, %c0_4] : memref<1x32xf32, #tpu.memory_space<vmem>>, vector<1x32xf32>
    %cst = arith.constant dense<0.000000e+00> : vector<16xf32>
    %3 = vector.multi_reduction <add>, %0, %cst [1] : vector<16x32xf32> to vector<16xf32>
    %4 = vector.shape_cast %3 : vector<16xf32> to vector<16x1xf32>
    %cst_5 = arith.constant 3.200000e+01 : f32
    %5 = vector.broadcast %cst_5 : f32 to vector<16x1xf32>
    %6 = arith.divf %4, %5 : vector<16x1xf32>
    %7 = vector.broadcast %6 : vector<16x1xf32> to vector<16x32xf32>
    %8 = arith.subf %0, %7 : vector<16x32xf32>
    %9 = arith.mulf %8, %8 : vector<16x32xf32>
    %cst_6 = arith.constant dense<0.000000e+00> : vector<16xf32>
    %10 = vector.multi_reduction <add>, %9, %cst_6 [1] : vector<16x32xf32> to vector<16xf32>
    %11 = vector.shape_cast %10 : vector<16xf32> to vector<16x1xf32>
    %cst_7 = arith.constant 0.0322580636 : f32
    %12 = vector.broadcast %cst_7 : f32 to vector<16x1xf32>
    %13 = arith.mulf %11, %12 : vector<16x1xf32>
    %14 = math.sqrt %13 : vector<16x1xf32>
    %cst_8 = arith.constant 1.000000e+06 : f32
    %15 = vector.broadcast %cst_8 : f32 to vector<16x1xf32>
    %16 = arith.addf %14, %15 : vector<16x1xf32>
    %17 = tpu.reciprocal %16 {approx = true} : vector<16x1xf32> -> vector<16x1xf32>
    %18 = vector.broadcast %1 : vector<1x32xf32> to vector<16x32xf32>
    %19 = arith.mulf %18, %8 : vector<16x32xf32>
    %20 = vector.broadcast %17 : vector<16x1xf32> to vector<16x32xf32>
    %21 = arith.mulf %19, %20 : vector<16x32xf32>
    %22 = vector.broadcast %2 : vector<1x32xf32> to vector<16x32xf32>
    %23 = arith.addf %21, %22 : vector<16x32xf32>
    %24 = arith.truncf %23 : vector<16x32xf32> to vector<16x32xbf16>
    %c0_9 = arith.constant 0 : index
    %c0_10 = arith.constant 0 : index
    %25 = vector.load %arg3[%c0_9, %c0_10] : memref<32x32xbf16, #tpu.memory_space<vmem>>, vector<32x32xbf16>
    %cst_11 = arith.constant dense<0.000000e+00> : vector<16x32xf32>
    %26 = tpu.matmul %24, %25, %cst_11 {dimension_numbers = #tpu.dot_dimension_numbers<[1], [0], [0], [1], [0, 0, 1, 1], [], []>} : vector<16x32xbf16>, vector<32x32xbf16>, vector<16x32xf32> -> vector<16x32xf32>
    %c0_12 = arith.constant 0 : index
    %c0_13 = arith.constant 0 : index
    %27 = vector.load %arg4[%c0_12, %c0_13] : memref<1x32xf32, #tpu.memory_space<vmem>>, vector<1x32xf32>
    %28 = vector.broadcast %27 : vector<1x32xf32> to vector<16x32xf32>
    %29 = arith.addf %26, %28 : vector<16x32xf32>
    %cst_14 = arith.constant 0.353553385 : f32
    %30 = vector.broadcast %cst_14 : f32 to vector<16x32xf32>
    %31 = arith.mulf %29, %30 : vector<16x32xf32>
    %c0_15 = arith.constant 0 : index
    %c0_16 = arith.constant 0 : index
    %32 = vector.load %arg5[%c0_15, %c0_16] : memref<32x32xbf16, #tpu.memory_space<vmem>>, vector<32x32xbf16>
    %cst_17 = arith.constant dense<0.000000e+00> : vector<16x32xf32>
    %33 = tpu.matmul %24, %32, %cst_17 {dimension_numbers = #tpu.dot_dimension_numbers<[1], [0], [0], [1], [0, 0, 1, 1], [], []>} : vector<16x32xbf16>, vector<32x32xbf16>, vector<16x32xf32> -> vector<16x32xf32>
    %c0_18 = arith.constant 0 : index
    %c0_19 = arith.constant 0 : index
    %34 = vector.load %arg6[%c0_18, %c0_19] : memref<1x32xf32, #tpu.memory_space<vmem>>, vector<1x32xf32>
    %35 = vector.broadcast %34 : vector<1x32xf32> to vector<16x32xf32>
    %36 = arith.addf %33, %35 : vector<16x32xf32>
    %c0_20 = arith.constant 0 : index
    %c0_21 = arith.constant 0 : index
    %37 = vector.load %arg7[%c0_20, %c0_21] : memref<32x32xbf16, #tpu.memory_space<vmem>>, vector<32x32xbf16>
    %cst_22 = arith.constant dense<0.000000e+00> : vector<16x32xf32>
    %38 = tpu.matmul %24, %37, %cst_22 {dimension_numbers = #tpu.dot_dimension_numbers<[1], [0], [0], [1], [0, 0, 1, 1], [], []>} : vector<16x32xbf16>, vector<32x32xbf16>, vector<16x32xf32> -> vector<16x32xf32>
    %c0_23 = arith.constant 0 : index
    %c0_24 = arith.constant 0 : index
    %39 = vector.load %arg8[%c0_23, %c0_24] : memref<1x32xf32, #tpu.memory_space<vmem>>, vector<1x32xf32>
    %40 = vector.broadcast %39 : vector<1x32xf32> to vector<16x32xf32>
    %41 = arith.addf %38, %40 : vector<16x32xf32>
    %42 = vector.extract_strided_slice %31 {offsets = [0, 0], sizes = [8, 32], strides = [1, 1]} : vector<16x32xf32> to vector<8x32xf32>
    %43 = vector.extract_strided_slice %36 {offsets = [0, 0], sizes = [8, 32], strides = [1, 1]} : vector<16x32xf32> to vector<8x32xf32>
    %44 = vector.extract_strided_slice %41 {offsets = [0, 0], sizes = [8, 32], strides = [1, 1]} : vector<16x32xf32> to vector<8x32xf32>
    %45 = vector.extract_strided_slice %42 {offsets = [0, 0], sizes = [8, 8], strides = [1, 1]} : vector<8x32xf32> to vector<8x8xf32>
    %46 = vector.extract_strided_slice %43 {offsets = [0, 0], sizes = [8, 8], strides = [1, 1]} : vector<8x32xf32> to vector<8x8xf32>
    %47 = vector.extract_strided_slice %44 {offsets = [0, 0], sizes = [8, 8], strides = [1, 1]} : vector<8x32xf32> to vector<8x8xf32>
    %cst_25 = arith.constant dense<0.000000e+00> : vector<8x8xf32>
    %48 = tpu.matmul %45, %46, %cst_25 {dimension_numbers = #tpu.dot_dimension_numbers<[1], [1], [0], [0], [0, 0, 1, 0], [], []>} : vector<8x8xf32>, vector<8x8xf32>, vector<8x8xf32> -> vector<8x8xf32>
    %cst_26 = arith.constant dense<0xFF800000> : vector<8xf32>
    %49 = vector.multi_reduction <maximumf>, %48, %cst_26 [1] : vector<8x8xf32> to vector<8xf32>
    %50 = vector.shape_cast %49 : vector<8xf32> to vector<8x1xf32>
    %51 = vector.broadcast %50 : vector<8x1xf32> to vector<8x8xf32>
    %52 = arith.subf %48, %51 : vector<8x8xf32>
    %53 = math.exp %52 : vector<8x8xf32>
    %cst_27 = arith.constant dense<0.000000e+00> : vector<8xf32>
    %54 = vector.multi_reduction <add>, %53, %cst_27 [1] : vector<8x8xf32> to vector<8xf32>
    %55 = vector.shape_cast %54 : vector<8xf32> to vector<8x1xf32>
    %56 = tpu.reciprocal %55 {approx = true} : vector<8x1xf32> -> vector<8x1xf32>
    %57 = vector.broadcast %56 : vector<8x1xf32> to vector<8x8xf32>
    %58 = arith.mulf %53, %57 : vector<8x8xf32>
    %cst_28 = arith.constant dense<0.000000e+00> : vector<8x8xf32>
    %59 = tpu.matmul %58, %47, %cst_28 {dimension_numbers = #tpu.dot_dimension_numbers<[1], [0], [0], [1], [0, 0, 1, 1], [], []>} : vector<8x8xf32>, vector<8x8xf32>, vector<8x8xf32> -> vector<8x8xf32>
    %c0_29 = arith.constant 0 : index
    %c0_30 = arith.constant 0 : index
    %60 = vector.load %arg18[%c0_29, %c0_30] : memref<16x32xf32, #tpu.memory_space<vmem>>, vector<8x8xf32>
    tpu.vector_store %arg18[%c0_29, %c0_30], %59 {strides = array<i32>} : memref<16x32xf32, #tpu.memory_space<vmem>>, vector<8x8xf32>,
    %61 = vector.extract_strided_slice %42 {offsets = [0, 8], sizes = [8, 8], strides = [1, 1]} : vector<8x32xf32> to vector<8x8xf32>
    %62 = vector.extract_strided_slice %43 {offsets = [0, 8], sizes = [8, 8], strides = [1, 1]} : vector<8x32xf32> to vector<8x8xf32>
    %63 = vector.extract_strided_slice %44 {offsets = [0, 8], sizes = [8, 8], strides = [1, 1]} : vector<8x32xf32> to vector<8x8xf32>
    %cst_31 = arith.constant dense<0.000000e+00> : vector<8x8xf32>
    %64 = tpu.matmul %61, %62, %cst_31 {dimension_numbers = #tpu.dot_dimension_numbers<[1], [1], [0], [0], [0, 0, 1, 0], [], []>} : vector<8x8xf32>, vector<8x8xf32>, vector<8x8xf32> -> vector<8x8xf32>
    %cst_32 = arith.constant dense<0xFF800000> : vector<8xf32>
    %65 = vector.multi_reduction <maximumf>, %64, %cst_32 [1] : vector<8x8xf32> to vector<8xf32>
    %66 = vector.shape_cast %65 : vector<8xf32> to vector<8x1xf32>
    %67 = vector.broadcast %66 : vector<8x1xf32> to vector<8x8xf32>
    %68 = arith.subf %64, %67 : vector<8x8xf32>
    %69 = math.exp %68 : vector<8x8xf32>
    %cst_33 = arith.constant dense<0.000000e+00> : vector<8xf32>
    %70 = vector.multi_reduction <add>, %69, %cst_33 [1] : vector<8x8xf32> to vector<8xf32>
    %71 = vector.shape_cast %70 : vector<8xf32> to vector<8x1xf32>
    %72 = tpu.reciprocal %71 {approx = true} : vector<8x1xf32> -> vector<8x1xf32>
    %73 = vector.broadcast %72 : vector<8x1xf32> to vector<8x8xf32>
    %74 = arith.mulf %69, %73 : vector<8x8xf32>
    %cst_34 = arith.constant dense<0.000000e+00> : vector<8x8xf32>
    %75 = tpu.matmul %74, %63, %cst_34 {dimension_numbers = #tpu.dot_dimension_numbers<[1], [0], [0], [1], [0, 0, 1, 1], [], []>} : vector<8x8xf32>, vector<8x8xf32>, vector<8x8xf32> -> vector<8x8xf32>
    %c0_35 = arith.constant 0 : index
    %c8 = arith.constant 8 : index
    %76 = vector.load %arg18[%c0_35, %c8] : memref<16x32xf32, #tpu.memory_space<vmem>>, vector<8x8xf32>
    tpu.vector_store %arg18[%c0_35, %c8], %75 {strides = array<i32>} : memref<16x32xf32, #tpu.memory_space<vmem>>, vector<8x8xf32>,
    %77 = vector.extract_strided_slice %42 {offsets = [0, 16], sizes = [8, 8], strides = [1, 1]} : vector<8x32xf32> to vector<8x8xf32>
    %78 = vector.extract_strided_slice %43 {offsets = [0, 16], sizes = [8, 8], strides = [1, 1]} : vector<8x32xf32> to vector<8x8xf32>
    %79 = vector.extract_strided_slice %44 {offsets = [0, 16], sizes = [8, 8], strides = [1, 1]} : vector<8x32xf32> to vector<8x8xf32>
    %cst_36 = arith.constant dense<0.000000e+00> : vector<8x8xf32>
    %80 = tpu.matmul %77, %78, %cst_36 {dimension_numbers = #tpu.dot_dimension_numbers<[1], [1], [0], [0], [0, 0, 1, 0], [], []>} : vector<8x8xf32>, vector<8x8xf32>, vector<8x8xf32> -> vector<8x8xf32>
    %cst_37 = arith.constant dense<0xFF800000> : vector<8xf32>
    %81 = vector.multi_reduction <maximumf>, %80, %cst_37 [1] : vector<8x8xf32> to vector<8xf32>
    %82 = vector.shape_cast %81 : vector<8xf32> to vector<8x1xf32>
    %83 = vector.broadcast %82 : vector<8x1xf32> to vector<8x8xf32>
    %84 = arith.subf %80, %83 : vector<8x8xf32>
    %85 = math.exp %84 : vector<8x8xf32>
    %cst_38 = arith.constant dense<0.000000e+00> : vector<8xf32>
    %86 = vector.multi_reduction <add>, %85, %cst_38 [1] : vector<8x8xf32> to vector<8xf32>
    %87 = vector.shape_cast %86 : vector<8xf32> to vector<8x1xf32>
    %88 = tpu.reciprocal %87 {approx = true} : vector<8x1xf32> -> vector<8x1xf32>
    %89 = vector.broadcast %88 : vector<8x1xf32> to vector<8x8xf32>
    %90 = arith.mulf %85, %89 : vector<8x8xf32>
    %cst_39 = arith.constant dense<0.000000e+00> : vector<8x8xf32>
    %91 = tpu.matmul %90, %79, %cst_39 {dimension_numbers = #tpu.dot_dimension_numbers<[1], [0], [0], [1], [0, 0, 1, 1], [], []>} : vector<8x8xf32>, vector<8x8xf32>, vector<8x8xf32> -> vector<8x8xf32>
    %c0_40 = arith.constant 0 : index
    %c16 = arith.constant 16 : index
    %92 = vector.load %arg18[%c0_40, %c16] : memref<16x32xf32, #tpu.memory_space<vmem>>, vector<8x8xf32>
    tpu.vector_store %arg18[%c0_40, %c16], %91 {strides = array<i32>} : memref<16x32xf32, #tpu.memory_space<vmem>>, vector<8x8xf32>,
    %93 = vector.extract_strided_slice %42 {offsets = [0, 24], sizes = [8, 8], strides = [1, 1]} : vector<8x32xf32> to vector<8x8xf32>
    %94 = vector.extract_strided_slice %43 {offsets = [0, 24], sizes = [8, 8], strides = [1, 1]} : vector<8x32xf32> to vector<8x8xf32>
    %95 = vector.extract_strided_slice %44 {offsets = [0, 24], sizes = [8, 8], strides = [1, 1]} : vector<8x32xf32> to vector<8x8xf32>
    %cst_41 = arith.constant dense<0.000000e+00> : vector<8x8xf32>
    %96 = tpu.matmul %93, %94, %cst_41 {dimension_numbers = #tpu.dot_dimension_numbers<[1], [1], [0], [0], [0, 0, 1, 0], [], []>} : vector<8x8xf32>, vector<8x8xf32>, vector<8x8xf32> -> vector<8x8xf32>
    %cst_42 = arith.constant dense<0xFF800000> : vector<8xf32>
    %97 = vector.multi_reduction <maximumf>, %96, %cst_42 [1] : vector<8x8xf32> to vector<8xf32>
    %98 = vector.shape_cast %97 : vector<8xf32> to vector<8x1xf32>
    %99 = vector.broadcast %98 : vector<8x1xf32> to vector<8x8xf32>
    %100 = arith.subf %96, %99 : vector<8x8xf32>
    %101 = math.exp %100 : vector<8x8xf32>
    %cst_43 = arith.constant dense<0.000000e+00> : vector<8xf32>
    %102 = vector.multi_reduction <add>, %101, %cst_43 [1] : vector<8x8xf32> to vector<8xf32>
    %103 = vector.shape_cast %102 : vector<8xf32> to vector<8x1xf32>
    %104 = tpu.reciprocal %103 {approx = true} : vector<8x1xf32> -> vector<8x1xf32>
    %105 = vector.broadcast %104 : vector<8x1xf32> to vector<8x8xf32>
    %106 = arith.mulf %101, %105 : vector<8x8xf32>
    %cst_44 = arith.constant dense<0.000000e+00> : vector<8x8xf32>
    %107 = tpu.matmul %106, %95, %cst_44 {dimension_numbers = #tpu.dot_dimension_numbers<[1], [0], [0], [1], [0, 0, 1, 1], [], []>} : vector<8x8xf32>, vector<8x8xf32>, vector<8x8xf32> -> vector<8x8xf32>
    %c0_45 = arith.constant 0 : index
    %c24 = arith.constant 24 : index
    %108 = vector.load %arg18[%c0_45, %c24] : memref<16x32xf32, #tpu.memory_space<vmem>>, vector<8x8xf32>
    tpu.vector_store %arg18[%c0_45, %c24], %107 {strides = array<i32>} : memref<16x32xf32, #tpu.memory_space<vmem>>, vector<8x8xf32>,
    %109 = vector.extract_strided_slice %31 {offsets = [8, 0], sizes = [8, 32], strides = [1, 1]} : vector<16x32xf32> to vector<8x32xf32>
    %110 = vector.extract_strided_slice %36 {offsets = [8, 0], sizes = [8, 32], strides = [1, 1]} : vector<16x32xf32> to vector<8x32xf32>
    %111 = vector.extract_strided_slice %41 {offsets = [8, 0], sizes = [8, 32], strides = [1, 1]} : vector<16x32xf32> to vector<8x32xf32>
    %112 = vector.extract_strided_slice %109 {offsets = [0, 0], sizes = [8, 8], strides = [1, 1]} : vector<8x32xf32> to vector<8x8xf32>
    %113 = vector.extract_strided_slice %110 {offsets = [0, 0], sizes = [8, 8], strides = [1, 1]} : vector<8x32xf32> to vector<8x8xf32>
    %114 = vector.extract_strided_slice %111 {offsets = [0, 0], sizes = [8, 8], strides = [1, 1]} : vector<8x32xf32> to vector<8x8xf32>
    %cst_46 = arith.constant dense<0.000000e+00> : vector<8x8xf32>
    %115 = tpu.matmul %112, %113, %cst_46 {dimension_numbers = #tpu.dot_dimension_numbers<[1], [1], [0], [0], [0, 0, 1, 0], [], []>} : vector<8x8xf32>, vector<8x8xf32>, vector<8x8xf32> -> vector<8x8xf32>
    %cst_47 = arith.constant dense<0xFF800000> : vector<8xf32>
    %116 = vector.multi_reduction <maximumf>, %115, %cst_47 [1] : vector<8x8xf32> to vector<8xf32>
    %117 = vector.shape_cast %116 : vector<8xf32> to vector<8x1xf32>
    %118 = vector.broadcast %117 : vector<8x1xf32> to vector<8x8xf32>
    %119 = arith.subf %115, %118 : vector<8x8xf32>
    %120 = math.exp %119 : vector<8x8xf32>
    %cst_48 = arith.constant dense<0.000000e+00> : vector<8xf32>
    %121 = vector.multi_reduction <add>, %120, %cst_48 [1] : vector<8x8xf32> to vector<8xf32>
    %122 = vector.shape_cast %121 : vector<8xf32> to vector<8x1xf32>
    %123 = tpu.reciprocal %122 {approx = true} : vector<8x1xf32> -> vector<8x1xf32>
    %124 = vector.broadcast %123 : vector<8x1xf32> to vector<8x8xf32>
    %125 = arith.mulf %120, %124 : vector<8x8xf32>
    %cst_49 = arith.constant dense<0.000000e+00> : vector<8x8xf32>
    %126 = tpu.matmul %125, %114, %cst_49 {dimension_numbers = #tpu.dot_dimension_numbers<[1], [0], [0], [1], [0, 0, 1, 1], [], []>} : vector<8x8xf32>, vector<8x8xf32>, vector<8x8xf32> -> vector<8x8xf32>
    %c8_50 = arith.constant 8 : index
    %c0_51 = arith.constant 0 : index
    %127 = vector.load %arg18[%c8_50, %c0_51] : memref<16x32xf32, #tpu.memory_space<vmem>>, vector<8x8xf32>
    tpu.vector_store %arg18[%c8_50, %c0_51], %126 {strides = array<i32>} : memref<16x32xf32, #tpu.memory_space<vmem>>, vector<8x8xf32>,
    %128 = vector.extract_strided_slice %109 {offsets = [0, 8], sizes = [8, 8], strides = [1, 1]} : vector<8x32xf32> to vector<8x8xf32>
    %129 = vector.extract_strided_slice %110 {offsets = [0, 8], sizes = [8, 8], strides = [1, 1]} : vector<8x32xf32> to vector<8x8xf32>
    %130 = vector.extract_strided_slice %111 {offsets = [0, 8], sizes = [8, 8], strides = [1, 1]} : vector<8x32xf32> to vector<8x8xf32>
    %cst_52 = arith.constant dense<0.000000e+00> : vector<8x8xf32>
    %131 = tpu.matmul %128, %129, %cst_52 {dimension_numbers = #tpu.dot_dimension_numbers<[1], [1], [0], [0], [0, 0, 1, 0], [], []>} : vector<8x8xf32>, vector<8x8xf32>, vector<8x8xf32> -> vector<8x8xf32>
    %cst_53 = arith.constant dense<0xFF800000> : vector<8xf32>
    %132 = vector.multi_reduction <maximumf>, %131, %cst_53 [1] : vector<8x8xf32> to vector<8xf32>
    %133 = vector.shape_cast %132 : vector<8xf32> to vector<8x1xf32>
    %134 = vector.broadcast %133 : vector<8x1xf32> to vector<8x8xf32>
    %135 = arith.subf %131, %134 : vector<8x8xf32>
    %136 = math.exp %135 : vector<8x8xf32>
    %cst_54 = arith.constant dense<0.000000e+00> : vector<8xf32>
    %137 = vector.multi_reduction <add>, %136, %cst_54 [1] : vector<8x8xf32> to vector<8xf32>
    %138 = vector.shape_cast %137 : vector<8xf32> to vector<8x1xf32>
    %139 = tpu.reciprocal %138 {approx = true} : vector<8x1xf32> -> vector<8x1xf32>
    %140 = vector.broadcast %139 : vector<8x1xf32> to vector<8x8xf32>
    %141 = arith.mulf %136, %140 : vector<8x8xf32>
    %cst_55 = arith.constant dense<0.000000e+00> : vector<8x8xf32>
    %142 = tpu.matmul %141, %130, %cst_55 {dimension_numbers = #tpu.dot_dimension_numbers<[1], [0], [0], [1], [0, 0, 1, 1], [], []>} : vector<8x8xf32>, vector<8x8xf32>, vector<8x8xf32> -> vector<8x8xf32>
    %c8_56 = arith.constant 8 : index
    %c8_57 = arith.constant 8 : index
    %143 = vector.load %arg18[%c8_56, %c8_57] : memref<16x32xf32, #tpu.memory_space<vmem>>, vector<8x8xf32>
    tpu.vector_store %arg18[%c8_56, %c8_57], %142 {strides = array<i32>} : memref<16x32xf32, #tpu.memory_space<vmem>>, vector<8x8xf32>,
    %144 = vector.extract_strided_slice %109 {offsets = [0, 16], sizes = [8, 8], strides = [1, 1]} : vector<8x32xf32> to vector<8x8xf32>
    %145 = vector.extract_strided_slice %110 {offsets = [0, 16], sizes = [8, 8], strides = [1, 1]} : vector<8x32xf32> to vector<8x8xf32>
    %146 = vector.extract_strided_slice %111 {offsets = [0, 16], sizes = [8, 8], strides = [1, 1]} : vector<8x32xf32> to vector<8x8xf32>
    %cst_58 = arith.constant dense<0.000000e+00> : vector<8x8xf32>
    %147 = tpu.matmul %144, %145, %cst_58 {dimension_numbers = #tpu.dot_dimension_numbers<[1], [1], [0], [0], [0, 0, 1, 0], [], []>} : vector<8x8xf32>, vector<8x8xf32>, vector<8x8xf32> -> vector<8x8xf32>
    %cst_59 = arith.constant dense<0xFF800000> : vector<8xf32>
    %148 = vector.multi_reduction <maximumf>, %147, %cst_59 [1] : vector<8x8xf32> to vector<8xf32>
    %149 = vector.shape_cast %148 : vector<8xf32> to vector<8x1xf32>
    %150 = vector.broadcast %149 : vector<8x1xf32> to vector<8x8xf32>
    %151 = arith.subf %147, %150 : vector<8x8xf32>
    %152 = math.exp %151 : vector<8x8xf32>
    %cst_60 = arith.constant dense<0.000000e+00> : vector<8xf32>
    %153 = vector.multi_reduction <add>, %152, %cst_60 [1] : vector<8x8xf32> to vector<8xf32>
    %154 = vector.shape_cast %153 : vector<8xf32> to vector<8x1xf32>
    %155 = tpu.reciprocal %154 {approx = true} : vector<8x1xf32> -> vector<8x1xf32>
    %156 = vector.broadcast %155 : vector<8x1xf32> to vector<8x8xf32>
    %157 = arith.mulf %152, %156 : vector<8x8xf32>
    %cst_61 = arith.constant dense<0.000000e+00> : vector<8x8xf32>
    %158 = tpu.matmul %157, %146, %cst_61 {dimension_numbers = #tpu.dot_dimension_numbers<[1], [0], [0], [1], [0, 0, 1, 1], [], []>} : vector<8x8xf32>, vector<8x8xf32>, vector<8x8xf32> -> vector<8x8xf32>
    %c8_62 = arith.constant 8 : index
    %c16_63 = arith.constant 16 : index
    %159 = vector.load %arg18[%c8_62, %c16_63] : memref<16x32xf32, #tpu.memory_space<vmem>>, vector<8x8xf32>
    tpu.vector_store %arg18[%c8_62, %c16_63], %158 {strides = array<i32>} : memref<16x32xf32, #tpu.memory_space<vmem>>, vector<8x8xf32>,
    %160 = vector.extract_strided_slice %109 {offsets = [0, 24], sizes = [8, 8], strides = [1, 1]} : vector<8x32xf32> to vector<8x8xf32>
    %161 = vector.extract_strided_slice %110 {offsets = [0, 24], sizes = [8, 8], strides = [1, 1]} : vector<8x32xf32> to vector<8x8xf32>
    %162 = vector.extract_strided_slice %111 {offsets = [0, 24], sizes = [8, 8], strides = [1, 1]} : vector<8x32xf32> to vector<8x8xf32>
    %cst_64 = arith.constant dense<0.000000e+00> : vector<8x8xf32>
    %163 = tpu.matmul %160, %161, %cst_64 {dimension_numbers = #tpu.dot_dimension_numbers<[1], [1], [0], [0], [0, 0, 1, 0], [], []>} : vector<8x8xf32>, vector<8x8xf32>, vector<8x8xf32> -> vector<8x8xf32>
    %cst_65 = arith.constant dense<0xFF800000> : vector<8xf32>
    %164 = vector.multi_reduction <maximumf>, %163, %cst_65 [1] : vector<8x8xf32> to vector<8xf32>
    %165 = vector.shape_cast %164 : vector<8xf32> to vector<8x1xf32>
    %166 = vector.broadcast %165 : vector<8x1xf32> to vector<8x8xf32>
    %167 = arith.subf %163, %166 : vector<8x8xf32>
    %168 = math.exp %167 : vector<8x8xf32>
    %cst_66 = arith.constant dense<0.000000e+00> : vector<8xf32>
    %169 = vector.multi_reduction <add>, %168, %cst_66 [1] : vector<8x8xf32> to vector<8xf32>
    %170 = vector.shape_cast %169 : vector<8xf32> to vector<8x1xf32>
    %171 = tpu.reciprocal %170 {approx = true} : vector<8x1xf32> -> vector<8x1xf32>
    %172 = vector.broadcast %171 : vector<8x1xf32> to vector<8x8xf32>
    %173 = arith.mulf %168, %172 : vector<8x8xf32>
    %cst_67 = arith.constant dense<0.000000e+00> : vector<8x8xf32>
    %174 = tpu.matmul %173, %162, %cst_67 {dimension_numbers = #tpu.dot_dimension_numbers<[1], [0], [0], [1], [0, 0, 1, 1], [], []>} : vector<8x8xf32>, vector<8x8xf32>, vector<8x8xf32> -> vector<8x8xf32>
    %c8_68 = arith.constant 8 : index
    %c24_69 = arith.constant 24 : index
    %175 = vector.load %arg18[%c8_68, %c24_69] : memref<16x32xf32, #tpu.memory_space<vmem>>, vector<8x8xf32>
    tpu.vector_store %arg18[%c8_68, %c24_69], %174 {strides = array<i32>} : memref<16x32xf32, #tpu.memory_space<vmem>>, vector<8x8xf32>,
    %c0_70 = arith.constant 0 : index
    %c0_71 = arith.constant 0 : index
    %176 = vector.load %arg18[%c0_70, %c0_71] : memref<16x32xf32, #tpu.memory_space<vmem>>, vector<16x32xf32>
    %177 = arith.truncf %176 : vector<16x32xf32> to vector<16x32xbf16>
    %c0_72 = arith.constant 0 : index
    %c0_73 = arith.constant 0 : index
    %178 = vector.load %arg9[%c0_72, %c0_73] : memref<32x32xbf16, #tpu.memory_space<vmem>>, vector<32x32xbf16>
    %cst_74 = arith.constant dense<0.000000e+00> : vector<16x32xf32>
    %179 = tpu.matmul %177, %178, %cst_74 {dimension_numbers = #tpu.dot_dimension_numbers<[1], [0], [0], [1], [0, 0, 1, 1], [], []>} : vector<16x32xbf16>, vector<32x32xbf16>, vector<16x32xf32> -> vector<16x32xf32>
    %c0_75 = arith.constant 0 : index
    %c0_76 = arith.constant 0 : index
    %180 = vector.load %arg10[%c0_75, %c0_76] : memref<1x32xf32, #tpu.memory_space<vmem>>, vector<1x32xf32>
    %181 = vector.broadcast %180 : vector<1x32xf32> to vector<16x32xf32>
    %182 = arith.addf %179, %181 : vector<16x32xf32>
    %183 = arith.addf %0, %182 : vector<16x32xf32>
    %c0_77 = arith.constant 0 : index
    %c0_78 = arith.constant 0 : index
    %184 = vector.load %arg11[%c0_77, %c0_78] : memref<1x32xf32, #tpu.memory_space<vmem>>, vector<1x32xf32>
    %c0_79 = arith.constant 0 : index
    %c0_80 = arith.constant 0 : index
    %185 = vector.load %arg12[%c0_79, %c0_80] : memref<1x32xf32, #tpu.memory_space<vmem>>, vector<1x32xf32>
    %cst_81 = arith.constant dense<0.000000e+00> : vector<16xf32>
    %186 = vector.multi_reduction <add>, %183, %cst_81 [1] : vector<16x32xf32> to vector<16xf32>
    %187 = vector.shape_cast %186 : vector<16xf32> to vector<16x1xf32>
    %cst_82 = arith.constant 3.200000e+01 : f32
    %188 = vector.broadcast %cst_82 : f32 to vector<16x1xf32>
    %189 = arith.divf %187, %188 : vector<16x1xf32>
    %190 = vector.broadcast %189 : vector<16x1xf32> to vector<16x32xf32>
    %191 = arith.subf %183, %190 : vector<16x32xf32>
    %192 = arith.mulf %191, %191 : vector<16x32xf32>
    %cst_83 = arith.constant dense<0.000000e+00> : vector<16xf32>
    %193 = vector.multi_reduction <add>, %192, %cst_83 [1] : vector<16x32xf32> to vector<16xf32>
    %194 = vector.shape_cast %193 : vector<16xf32> to vector<16x1xf32>
    %cst_84 = arith.constant 0.0322580636 : f32
    %195 = vector.broadcast %cst_84 : f32 to vector<16x1xf32>
    %196 = arith.mulf %194, %195 : vector<16x1xf32>
    %197 = math.sqrt %196 : vector<16x1xf32>
    %cst_85 = arith.constant 1.000000e+06 : f32
    %198 = vector.broadcast %cst_85 : f32 to vector<16x1xf32>
    %199 = arith.addf %197, %198 : vector<16x1xf32>
    %200 = tpu.reciprocal %199 {approx = true} : vector<16x1xf32> -> vector<16x1xf32>
    %201 = vector.broadcast %184 : vector<1x32xf32> to vector<16x32xf32>
    %202 = arith.mulf %201, %191 : vector<16x32xf32>
    %203 = vector.broadcast %200 : vector<16x1xf32> to vector<16x32xf32>
    %204 = arith.mulf %202, %203 : vector<16x32xf32>
    %205 = vector.broadcast %185 : vector<1x32xf32> to vector<16x32xf32>
    %206 = arith.addf %204, %205 : vector<16x32xf32>
    %207 = arith.truncf %206 : vector<16x32xf32> to vector<16x32xbf16>
    %c0_86 = arith.constant 0 : index
    %c0_87 = arith.constant 0 : index
    %208 = vector.load %arg13[%c0_86, %c0_87] : memref<32x64xbf16, #tpu.memory_space<vmem>>, vector<32x64xbf16>
    %cst_88 = arith.constant dense<0.000000e+00> : vector<16x64xf32>
    %209 = tpu.matmul %207, %208, %cst_88 {dimension_numbers = #tpu.dot_dimension_numbers<[1], [0], [0], [1], [0, 0, 1, 1], [], []>} : vector<16x32xbf16>, vector<32x64xbf16>, vector<16x64xf32> -> vector<16x64xf32>
    %c0_89 = arith.constant 0 : index
    %c0_90 = arith.constant 0 : index
    %210 = vector.load %arg14[%c0_89, %c0_90] : memref<1x64xf32, #tpu.memory_space<vmem>>, vector<1x64xf32>
    %211 = vector.broadcast %210 : vector<1x64xf32> to vector<16x64xf32>
    %212 = arith.addf %209, %211 : vector<16x64xf32>
    %cst_91 = arith.constant 0.000000e+00 : f32
    %213 = vector.broadcast %cst_91 : f32 to vector<16x64xf32>
    %214 = arith.maximumf %212, %213 : vector<16x64xf32>
    %215 = arith.truncf %214 : vector<16x64xf32> to vector<16x64xbf16>
    %c0_92 = arith.constant 0 : index
    %c0_93 = arith.constant 0 : index
    %216 = vector.load %arg15[%c0_92, %c0_93] : memref<64x32xbf16, #tpu.memory_space<vmem>>, vector<64x32xbf16>
    %cst_94 = arith.constant dense<0.000000e+00> : vector<16x32xf32>
    %217 = tpu.matmul %215, %216, %cst_94 {dimension_numbers = #tpu.dot_dimension_numbers<[1], [0], [0], [1], [0, 0, 1, 1], [], []>} : vector<16x64xbf16>, vector<64x32xbf16>, vector<16x32xf32> -> vector<16x32xf32>
    %c0_95 = arith.constant 0 : index
    %c0_96 = arith.constant 0 : index
    %218 = vector.load %arg16[%c0_95, %c0_96] : memref<1x32xf32, #tpu.memory_space<vmem>>, vector<1x32xf32>
    %219 = vector.broadcast %218 : vector<1x32xf32> to vector<16x32xf32>
    %220 = arith.addf %217, %219 : vector<16x32xf32>
    %221 = arith.addf %183, %220 : vector<16x32xf32>
    %c0_97 = arith.constant 0 : index
    %c0_98 = arith.constant 0 : index
    %222 = vector.load %arg17[%c0_97, %c0_98] : memref<16x32xf32, #tpu.memory_space<vmem>>, vector<16x32xf32>
    tpu.vector_store %arg17[%c0_97, %c0_98], %221 {strides = array<i32>} : memref<16x32xf32, #tpu.memory_space<vmem>>, vector<16x32xf32>,
    return
  }
}

</mosaic_0001>

<bundles_post_ra>
// kernel: tpu_custom_call.1
= control target key start
LH: loop header
LB: loop body
LE: loop exit
PB: predicated region body
PF: predicated region fallthrough
CT: control target
= control target key end

     0   :  { %s3073_s0 = inlined_call_operand.vmem [shape: f32[16,32], index: 0, kind: input, shape index: {}]   ;;  %s3074_s1 = inlined_call_operand.vmem [shape: f32[1,32], index: 1, kind: input, shape index: {}]   ;;  %s3075_s2 = inlined_call_operand.hbm [shape: f32[1,32], index: 2, kind: input, shape index: {}]   ;;  %s3076_s3 = inlined_call_operand.vmem [shape: bf16[32,32], index: 3, kind: input, shape index: {}]   ;;  %s3077_s4 = inlined_call_operand.hbm [shape: f32[1,32], index: 4, kind: input, shape index: {}]   ;;  %s3078_s5 = inlined_call_operand.vmem [shape: bf16[32,32], index: 5, kind: input, shape index: {}]   ;;  %s3079_s6 = inlined_call_operand.hbm [shape: f32[1,32], index: 6, kind: input, shape index: {}]   ;;  %s3080_s7 = inlined_call_operand.hbm [shape: bf16[32,32], index: 7, kind: input, shape index: {}]   ;;  %s3081_s8 = inlined_call_operand.hbm [shape: f32[1,32], index: 8, kind: input, shape index: {}]   ;;  %s3082_s9 = inlined_call_operand.vmem [shape: bf16[32,32], index: 9, kind: input, shape index: {}]   ;;  %s3083_s10 = inlined_call_operand.hbm [shape: f32[1,32], index: 10, kind: input, shape index: {}]   ;;  %s3084_s11 = inlined_call_operand.hbm [shape: f32[1,32], index: 11, kind: input, shape index: {}]   ;;  %s3085_s12 = inlined_call_operand.hbm [shape: f32[1,32], index: 12, kind: input, shape index: {}]   ;;  %s3086_s13 = inlined_call_operand.vmem [shape: bf16[32,64], index: 13, kind: input, shape index: {}]   ;;  %s3087_s14 = inlined_call_operand.vmem [shape: f32[1,64], index: 14, kind: input, shape index: {}]   ;;  %s3088_s15 = inlined_call_operand.vmem [shape: bf16[64,32], index: 15, kind: input, shape index: {}]   ;;  %s3089_s16 = inlined_call_operand.vmem [shape: f32[1,32], index: 16, kind: input, shape index: {}]   ;;  %s3090_s17 = inlined_call_operand.hbm [shape: f32[16,32], index: 17, kind: output, shape index: {}]  }
   0x1   :  { %3092 = sst [smem:[#allocation24_spill]] %s3073_s0 }
   0x2   :  { %3093 = sst [smem:[#allocation25_spill]] %s3074_s1 }
   0x3   :  { %22 = vsyncpa [#allocation4], 0 }
   0x4   :  { %23 = vsyncpa [#allocation7], 0 }
   0x5   :  { %24 = vsyncpa [#allocation10], 0 }
   0x6   :  { %25 = vsyncpa [#allocation13], 0 }
   0x7   :  { %26 = vsyncpa [#allocation16], 0 }
   0x8   :  { %27 = vsyncpa [#allocation5], 0  ;;  %s2601_s24 = smov [#allocation6]   ;;  %s2602_s26 = smov [#allocation9]  }
   0x9   :  { %s50_s25 = sshll.u32 %s2601_s24, 4  ;;  %s71_s27 = sshll.u32 %s2602_s26, 4  ;;  %s51_s25 = int_to_ptr.vmem [resolvable:$true] %s50_s25  ;;  %s2711_s27 = int_to_ptr.vmem [resolvable:$true] %s71_s27 }
   0xa   :  { %s2391_s0 = scalar_lea.hbm %s3077_s4, 16 }
   0xb   :  { %p2392_p0 = scmp.ne.s32.totalorder %s3077_s4, %s2391_s0  ;;  %p2395_p1 = scmp.lt.u32.totalorder %s2391_s0, %s3077_s4 }
   0xd   :  { %p2397_p2 = pnand %p2395_p1, %p2392_p0 }
   0xf   :  { %2400 = shalt.err (!%p2397_p2)
}
  0x10   :  { %s2401_s20 = scalar_lea.vmem %s51_s25, 16  ;;  %s2405_s21 = scalar_lea.vmem %s51_s25, 32 }
  0x11   :  { %p2402_p3 = scmp.ne.s32.totalorder %s51_s25, %s2401_s20  ;;  %p2406_p4 = scmp.lt.s32.totalorder %s51_s25, %s51_s25 }
  0x12   :  { %p2407_p5 = scmp.lt.s32.totalorder %s2405_s21, %s2401_s20 }
  0x14   :  { %p2408_p6 = por %p2407_p5, %p2406_p4 }
  0x16   :  { %p2409_p7 = pnand %p2408_p6, %p2402_p3 }
  0x18   :  { %2412 = shalt.err (!%p2409_p7)
}
  0x19   :  { %53 = dma.hbm_to_vmem [thread:$0]  %s3077_s4, 16, %s51_s25, [#allocation7]  }
  0x1a   :  { %s2413_s28 = scalar_lea.hbm %s3080_s7, 256 }
  0x1b   :  { %p2414_p8 = scmp.ne.s32.totalorder %s3080_s7, %s2413_s28  ;;  %p2417_p9 = scmp.lt.u32.totalorder %s2413_s28, %s3080_s7 }
  0x1d   :  { %p2419_p10 = pnand %p2417_p9, %p2414_p8 }
  0x1f   :  { %2422 = shalt.err (!%p2419_p10)
}
  0x20   :  { %s2423_s19 = scalar_lea.vmem %s2711_s27, 256  ;;  %p2428_p12 = scmp.lt.s32.totalorder %s2711_s27, %s2711_s27 }
  0x21   :  { %p2424_p11 = scmp.ne.s32.totalorder %s2711_s27, %s2423_s19  ;;  %p2429_p13 = scmp.lt.s32.totalorder %s2423_s19, %s2423_s19 }
  0x23   :  { %p2430_p0 = por %p2429_p13, %p2428_p12 }
  0x25   :  { %p2431_p1 = pnand %p2430_p0, %p2424_p11 }
  0x27   :  { %2434 = shalt.err (!%p2431_p1)
}
  0x28   :  { %s2603_s4 = smov 64   ;;  %s2604_s25 = smov 4  }
  0x29   :  { %77 = dma.hbm_to_vmem [thread:$0]  %s3080_s7, 256, %s2711_s27, [#allocation10], %s2603_s4, %s2603_s4, %s2604_s25  }
  0x2a   :  { %s2605_s21 = smov [#allocation12]   ;;  %s2606_s23 = smov [#allocation3]  }
  0x2b   :  { %s96_s22 = sshll.u32 %s2605_s21, 4  ;;  %s38_s24 = sshll.u32 %s2606_s23, 4  ;;  %s97_s22 = int_to_ptr.vmem [resolvable:$true] %s96_s22  ;;  %s39_s24 = int_to_ptr.vmem [resolvable:$true] %s38_s24 }
  0x2c   :  { %s2435_s29 = scalar_lea.hbm %s3083_s10, 16 }
  0x2d   :  { %p2436_p2 = scmp.ne.s32.totalorder %s3083_s10, %s2435_s29  ;;  %p2439_p3 = scmp.lt.u32.totalorder %s2435_s29, %s3083_s10 }
  0x2f   :  { %p2441_p4 = pnand %p2439_p3, %p2436_p2 }
  0x31   :  { %2444 = shalt.err (!%p2441_p4)
}
  0x32   :  { %s2445_s7 = scalar_lea.vmem %s97_s22, 16  ;;  %s2449_s27 = scalar_lea.vmem %s97_s22, 32 }
  0x33   :  { %p2446_p5 = scmp.ne.s32.totalorder %s97_s22, %s2445_s7  ;;  %p2450_p6 = scmp.lt.s32.totalorder %s97_s22, %s97_s22 }
  0x34   :  { %p2451_p7 = scmp.lt.s32.totalorder %s2449_s27, %s2445_s7 }
  0x36   :  { %p2452_p8 = por %p2451_p7, %p2450_p6 }
  0x38   :  { %p2453_p9 = pnand %p2452_p8, %p2446_p5 }
  0x3a   :  { %2456 = shalt.err (!%p2453_p9)
}
  0x3b   :  { %99 = dma.hbm_to_vmem [thread:$0]  %s3083_s10, 16, %s97_s22, [#allocation13]  }
  0x3c   :  { %s2457_s21 = scalar_lea.hbm %s3075_s2, 16 }
  0x3d   :  { %p2458_p10 = scmp.ne.s32.totalorder %s3075_s2, %s2457_s21  ;;  %p2461_p11 = scmp.lt.u32.totalorder %s2457_s21, %s3075_s2 }
  0x3f   :  { %p2463_p12 = pnand %p2461_p11, %p2458_p10 }
  0x41   :  { %2466 = shalt.err (!%p2463_p12)
}
  0x42   :  { %s2467_s0 = scalar_lea.vmem %s39_s24, 16  ;;  %s2471_s30 = scalar_lea.vmem %s39_s24, 32 }
  0x43   :  { %p2468_p13 = scmp.ne.s32.totalorder %s39_s24, %s2467_s0  ;;  %p2472_p0 = scmp.lt.s32.totalorder %s39_s24, %s39_s24 }
  0x44   :  { %p2473_p1 = scmp.lt.s32.totalorder %s2471_s30, %s2467_s0 }
  0x46   :  { %p2474_p2 = por %p2473_p1, %p2472_p0 }
  0x48   :  { %p2475_p3 = pnand %p2474_p2, %p2468_p13 }
  0x4a   :  { %2478 = shalt.err (!%p2475_p3)
}
  0x4b   :  { %41 = dma.hbm_to_vmem [thread:$0]  %s3075_s2, 16, %s39_s24, [#allocation4]  }
  0x4c   :  { %s2607_s18 = smov [#allocation8]   ;;  %s2608_s7 = smov [#allocation11]  }
  0x4d   :  { %s62_s19 = sshll.u32 %s2607_s18, 4  ;;  %s84_s27 = sshll.u32 %s2608_s7, 4  ;;  %s63_s19 = int_to_ptr.vmem [resolvable:$true] %s62_s19  ;;  %s85_s27 = int_to_ptr.vmem [resolvable:$true] %s84_s27 }
  0x4e   :  { %s2479_s1 = scalar_lea.hbm %s3079_s6, 16 }
  0x4f   :  { %p2480_p4 = scmp.ne.s32.totalorder %s3079_s6, %s2479_s1  ;;  %p2483_p5 = scmp.lt.u32.totalorder %s2479_s1, %s3079_s6 }
  0x51   :  { %p2485_p6 = pnand %p2483_p5, %p2480_p4 }
  0x53   :  { %2488 = shalt.err (!%p2485_p6)
}
  0x54   :  { %s2489_s2 = scalar_lea.vmem %s63_s19, 16  ;;  %s2493_s24 = scalar_lea.vmem %s63_s19, 32 }
  0x55   :  { %p2490_p7 = scmp.ne.s32.totalorder %s63_s19, %s2489_s2  ;;  %p2494_p8 = scmp.lt.s32.totalorder %s63_s19, %s63_s19 }
  0x56   :  { %p2495_p9 = scmp.lt.s32.totalorder %s2493_s24, %s2489_s2 }
  0x58   :  { %p2496_p10 = por %p2495_p9, %p2494_p8 }
  0x5a   :  { %p2497_p11 = pnand %p2496_p10, %p2490_p7 }
  0x5c   :  { %2500 = shalt.err (!%p2497_p11)
}
  0x5d   :  { %65 = dma.hbm_to_vmem [thread:$0]  %s3079_s6, 16, %s63_s19, [#allocation7]  }
  0x5e   :  { %s2501_s10 = scalar_lea.hbm %s3081_s8, 16 }
  0x5f   :  { %p2502_p12 = scmp.ne.s32.totalorder %s3081_s8, %s2501_s10  ;;  %p2505_p13 = scmp.lt.u32.totalorder %s2501_s10, %s3081_s8 }
  0x61   :  { %p2507_p0 = pnand %p2505_p13, %p2502_p12 }
  0x63   :  { %2510 = shalt.err (!%p2507_p0)
}
  0x64   :  { %s2511_s25 = scalar_lea.vmem %s85_s27, 16  ;;  %s2515_s1 = scalar_lea.vmem %s85_s27, 32 }
  0x65   :  { %p2512_p1 = scmp.ne.s32.totalorder %s85_s27, %s2511_s25  ;;  %p2516_p2 = scmp.lt.s32.totalorder %s85_s27, %s85_s27 }
  0x66   :  { %p2517_p3 = scmp.lt.s32.totalorder %s2515_s1, %s2511_s25 }
  0x68   :  { %p2518_p4 = por %p2517_p3, %p2516_p2 }
  0x6a   :  { %p2519_p5 = pnand %p2518_p4, %p2512_p1 }
  0x6c   :  { %2522 = shalt.err (!%p2519_p5)
}
  0x6d   :  { %87 = dma.hbm_to_vmem [thread:$0]  %s3081_s8, 16, %s85_s27, [#allocation10]  }
  0x6e   :  { %s2609_s20 = smov [#allocation14]   ;;  %s2610_s23 = smov [#allocation15]  }
  0x6f   :  { %s106_s21 = sshll.u32 %s2609_s20, 4  ;;  %s116_s26 = sshll.u32 %s2610_s23, 4  ;;  %s107_s21 = int_to_ptr.vmem [resolvable:$true] %s106_s21  ;;  %s117_s26 = int_to_ptr.vmem [resolvable:$true] %s116_s26 }
  0x70   :  { %s2523_s28 = scalar_lea.hbm %s3084_s11, 16 }
  0x71   :  { %p2524_p6 = scmp.ne.s32.totalorder %s3084_s11, %s2523_s28  ;;  %p2527_p7 = scmp.lt.u32.totalorder %s2523_s28, %s3084_s11 }
  0x73   :  { %p2529_p8 = pnand %p2527_p7, %p2524_p6 }
  0x75   :  { %2532 = shalt.err (!%p2529_p8)
}
  0x76   :  { %s2533_s8 = scalar_lea.vmem %s107_s21, 16  ;;  %s2537_s27 = scalar_lea.vmem %s107_s21, 32 }
  0x77   :  { %p2534_p9 = scmp.ne.s32.totalorder %s107_s21, %s2533_s8  ;;  %p2538_p10 = scmp.lt.s32.totalorder %s107_s21, %s107_s21 }
  0x78   :  { %p2539_p11 = scmp.lt.s32.totalorder %s2537_s27, %s2533_s8 }
  0x7a   :  { %p2540_p12 = por %p2539_p11, %p2538_p10 }
  0x7c   :  { %p2541_p13 = pnand %p2540_p12, %p2534_p9 }
  0x7e   :  { %2544 = shalt.err (!%p2541_p13)
}
  0x7f   :  { %109 = dma.hbm_to_vmem [thread:$0]  %s3084_s11, 16, %s107_s21, [#allocation13]  }
  0x80   :  { %s2545_s25 = scalar_lea.hbm %s3085_s12, 16 }
  0x81   :  { %p2546_p0 = scmp.ne.s32.totalorder %s3085_s12, %s2545_s25  ;;  %p2549_p1 = scmp.lt.u32.totalorder %s2545_s25, %s3085_s12 }
  0x83   :  { %p2551_p2 = pnand %p2549_p1, %p2546_p0 }
  0x85   :  { %2554 = shalt.err (!%p2551_p2)
}
  0x86   :  { %s2555_s23 = scalar_lea.vmem %s117_s26, 16  ;;  %s2559_s2 = scalar_lea.vmem %s117_s26, 32 }
  0x87   :  { %p2556_p3 = scmp.ne.s32.totalorder %s117_s26, %s2555_s23  ;;  %p2560_p4 = scmp.lt.s32.totalorder %s117_s26, %s117_s26 }
  0x88   :  { %p2561_p5 = scmp.lt.s32.totalorder %s2559_s2, %s2555_s23 }
  0x8a   :  { %p2562_p6 = por %p2561_p5, %p2560_p4 }
  0x8c   :  { %p2563_p7 = pnand %p2562_p6, %p2556_p3 }
  0x8e   :  { %2566 = shalt.err (!%p2563_p7)
}
  0x8f   :  { %119 = dma.hbm_to_vmem [thread:$0]  %s3085_s12, 16, %s117_s26, [#allocation16]  }
  0x90   :  { %2589 = dma.done.wait [#allocation4], 16  }
  0x91   :  { %2590 = vsyncadd [#allocation4], 4294967280 }
  0x92   :  { %2591 = dma.done.wait [#allocation7], 32  }
  0x93   :  { %2592 = vsyncadd [#allocation7], 4294967264 }
  0x94   :  { %2593 = dma.done.wait [#allocation10], 272  }
  0x95   :  { %2594 = vsyncadd [#allocation10], 4294967024 }
  0x96   :  { %2595 = dma.done.wait [#allocation13], 32  }
  0x97   :  { %2596 = vsyncadd [#allocation13], 4294967264 }
  0x98   :  { %2597 = dma.done.wait [#allocation16], 16  }
  0x99   :  { %2598 = vsyncadd [#allocation16], 4294967280  ;;  %vm157_vm0 = vcmask 261120   ;;  %s3094_s29 = sld [smem:[#allocation24_spill]]  ;;  %v2329_v14 = vld [vmem:[%s3076_s3] sm:$0xff]   ;;  %v2330_v15 = vld [vmem:[#allocation9] sm:$0xff]  }
  0x9a   :  { %v2611_v16 = vmov 0.0   ;;  %v2331_v17 = vld [vmem:[%s3076_s3 + $0x8] sm:$0xff]   ;;  %v2332_v18 = vld [vmem:[#allocation9 + $0x8] sm:$0xff]   ;;  %vm2612_vm1 = vmmov 0   ;;  %s3095_s22 = sld [smem:[#allocation25_spill]]  ;;  %vm413_vm6 = vcmask 64512  }
  0x9b   :  { %2177 = vmatprep.subr.bf16.mxu1 %v2611_v16  ;;  %2193 = vmatprep.subr.bf16.mxu0 %v2611_v16  ;;  %v2072_v41 = vld [vmem:[#allocation3] ss:$0 sm:$0xff]  ;;  %v2333_v45 = vld [vmem:[%s3078_s5] sm:$0xff]   ;;  %v2334_v47 = vld [vmem:[%s3078_s5 + $0x8] sm:$0xff]   ;;  %s2613_s5 = smov 120   ;;  %s2614_s1 = smov 112  }
  0x9c   :  { %2178 = vmatpush3.bf16.msra.mxu1 %v2329_v14  ;;  %2194 = vmatpush3.bf16.msra.mxu0 %v2330_v15  ;;  %v2073_v48 = vld [vmem:[#allocation6] ss:$0 sm:$0xff]  ;;  %v2081_v54 = vld [vmem:[#allocation11] ss:$0 sm:$0xff]  ;;  %v2077_v61 = vld [vmem:[#allocation8] ss:$0 sm:$0xff] }
  0x9d   :  { %2179 = vmatprep.subr.bf16.mxu1 %v2611_v16  ;;  %2195 = vmatprep.subr.bf16.mxu0 %v2611_v16  ;;  %s2615_s6 = smov 104   ;;  %s2616_s19 = smov 8   ;;  %vm745_vm7 = vcmask 130112   ;;  %vm916_vm8 = vcmask 195712   ;;  %vm1087_vm9 = vcmask 261312   ;;  %vm2001_vm14 = vcmask 523264  }
  0x9e   :  { %2181 = vmatprep.mubr.msk.bf16.mxu1 %vm2612_vm1, %v2611_v16  ;;  %2197 = vmatprep.mubr.msk.bf16.mxu0 %vm2612_vm1, %v2611_v16  ;;  %s2617_s20 = smov 16   ;;  %s2618_s23 = smov 24  }
  0x9f   :  { %v2817_v0 = vld [vmem:[%s3094_s29] sm:$0xff]  ;;  %v2822_v1 = vld [vmem:[%s3094_s29 + $0x8] sm:$0xff] }
  0xa0   :  { %v158_v2 = vsel %vm157_vm0, %v2817_v0, 0.0  ;;  %v161_v3 = vsel %vm157_vm0, %v2822_v1, 0.0  ;;  %2180 = vmatpush3.bf16.msra.mxu1 %v2331_v17  ;;  %2196 = vmatpush3.bf16.msra.mxu0 %v2332_v18  ;;  %v2071_v35 = vld [vmem:[%s3095_s22] ss:$0 sm:$0xff] }
  0xa1   :  { %159 = vadd.xlane.f32.xlu0 %v158_v2  ;;  %2185 = vmatprep.subr.bf16.mxu1 %v2611_v16 }
  0xa2   :  { %2211 = vmatprep.subr.mxu0 %v2611_v16 }
  0xa5   :  { %162 = vadd.xlane.f32.xlu0 %v161_v3 }
 0x12e   :  { %v160_v4 = vpop.xlane.xlu0 %159 }
 0x12f   :  { %v165_v5 = vmul.f32 0.03125, %v160_v4 }
 0x131   :  { %v167_v6 = vsub.f32 %v2817_v0, %v165_v5 }
 0x132   :  { %v163_v7 = vpop.xlane.xlu0 %162 }
 0x133   :  { %v166_v8 = vmul.f32 0.03125, %v163_v7  ;;  %v169_v9 = vmul.f32 %v167_v6, %v167_v6  ;;  %v203_v37 = vmul.f32 %v2071_v35, %v167_v6 }
 0x135   :  { %v168_v10 = vsub.f32 %v2822_v1, %v166_v8  ;;  %v171_v11 = vsel %vm157_vm0, %v169_v9, 0.0 }
 0x136   :  { %172 = vadd.xlane.f32.xlu1 %v171_v11 }
 0x137   :  { %v170_v12 = vmul.f32 %v168_v10, %v168_v10  ;;  %v204_v38 = vmul.f32 %v2071_v35, %v168_v10 }
 0x139   :  { %v174_v13 = vsel %vm157_vm0, %v170_v12, 0.0 }
 0x13a   :  { %175 = vadd.xlane.f32.xlu1 %v174_v13 }
 0x1c3   :  { %v173_v19 = vpop.xlane.xlu1 %172 }
 0x1c4   :  { %v177_v20 = vmul.f32 0.032258064, %v173_v19 }
 0x1c6   :  { %2343 = vrsqrt.f32 %v177_v20  ;;  %vm181_vm2 = vcmp.eq.f32.partialorder %v177_v20, inf  ;;  %v184_v25 = vand.u32 2147483648, %v177_v20  ;;  %vm183_vm3 = vcmp.eq.f32.partialorder %v177_v20, 0.0 }
 0x1c7   :  { %v176_v21 = vpop.xlane.xlu1 %175 }
 0x1c8   :  { %v178_v22 = vmul.f32 0.032258064, %v176_v21 }
 0x1ca   :  { %2345 = vrsqrt.f32 %v178_v22  ;;  %vm188_vm4 = vcmp.eq.f32.partialorder %v178_v22, inf  ;;  %v191_v31 = vand.u32 2147483648, %v178_v22  ;;  %vm190_vm5 = vcmp.eq.f32.partialorder %v178_v22, 0.0 }
 0x1d0   :  { %v2344_v23 = vpop.eup %2343 }
 0x1d1   :  { %v180_v24 = vmul.f32 %v2344_v23, %v177_v20 }
 0x1d3   :  { %v182_v26 = vsel %vm181_vm2, %v177_v20, %v180_v24 }
 0x1d4   :  { %v2346_v27 = vpop.eup %2345  ;;  %v185_v28 = vsel %vm183_vm3, %v184_v25, %v182_v26 }
 0x1d5   :  { %v193_v29 = vadd.f32 1000000.0, %v185_v28  ;;  %v187_v30 = vmul.f32 %v2346_v27, %v178_v22 }
 0x1d7   :  { %2347 = vrcp.f32 %v193_v29  ;;  %v189_v32 = vsel %vm188_vm4, %v178_v22, %v187_v30 }
 0x1d8   :  { %v192_v33 = vsel %vm190_vm5, %v191_v31, %v189_v32 }
 0x1d9   :  { %v194_v34 = vadd.f32 1000000.0, %v192_v33 }
 0x1db   :  { %2349 = vrcp.f32 %v194_v34 }
 0x1e1   :  { %v2348_v36 = vpop.eup %2347 }
 0x1e2   :  { %v205_v39 = vmul.f32 %v2348_v36, %v203_v37 }
 0x1e4   :  { %v213_v43 = vadd.f32 %v2072_v41, %v205_v39 }
 0x1e5   :  { %v2350_v40 = vpop.eup %2349 }
 0x1e6   :  { %v206_v42 = vmul.f32 %v2350_v40, %v204_v38 }
 0x1e8   :  { %v214_v44 = vadd.f32 %v2072_v41, %v206_v42 }
 0x1ea   :  { %v215_v46 = vpack.c.bf16 %v214_v44, %v213_v43 }
 0x1ec   :  { %2182 = vmatmul.mubr.msk.bf16.vlgmr.msra.gmra.mrb[0].mxu1 %vm157_vm0, %v215_v46  ;;  %2198 = vmatmul.mubr.msk.bf16.vlgmr.msra.gmra.mrb[0].mxu0 %vm157_vm0, %v215_v46 }
 0x1ed   :  { %2186 = vmatpush3.bf16.msra.mxu1 %v2333_v45  ;;  %2189 = vmatprep.mubr.msk.bf16.mxu1 %vm2612_vm1, %v2611_v16 }
 0x1ee   :  { %2187 = vmatprep.subr.bf16.mxu1 %v2611_v16  ;;  %2213 = vmatprep.mubr.msk.f32.mxu0 %vm2612_vm1, %v2611_v16 }
 0x1f1   :  { %2188 = vmatpush3.bf16.msra.mxu1 %v2334_v47 }
 0x1f2   :  { %2201 = vmatprep.subr.mxu1 %v2611_v16 }
 0x1f4   :  { %2190 = vmatmul.mubr.msk.bf16.vlgmr.msra.gmra.mrb[4].mxu1 %vm157_vm0, %v215_v46 }
 0x1f5   :  { %2203 = vmatprep.mubr.msk.f32.mxu1 %vm2612_vm1, %v2611_v16 }
 0x2bf   :  { %v276_v49 = vpop.f32.mrb[0].mxu1  ;;  %v406_v50 = vpop.f32.mrb[0].mxu0 }
 0x2c0   :  { %v277_v51 = vadd.f32 %v2073_v48, %v276_v49  ;;  %v2183_v52 = vpop.f32.mrb[1].mxu1  ;;  %v2199_v53 = vpop.f32.mrb[1].mxu0  ;;  %v2875_v5 = vadd.f32 %v2081_v54, %v406_v50 }
 0x2c1   :  { %v279_v55 = vpop.f32.mrb[2].mxu1  ;;  %v409_v56 = vpop.f32.mrb[2].mxu0 }
 0x2c2   :  { %v283_v57 = vmul.f32 0.35355338, %v277_v51  ;;  %v2868_v58 = vadd.f32 %v2081_v54, %v409_v56  ;;  %v2184_v59 = vpop.f32.mrb[3].mxu1  ;;  %v2200_v60 = vpop.f32.mrb[3].mxu0  ;;  %v280_v6 = vadd.f32 %v2073_v48, %v279_v55 }
 0x2c4   :  { %575 = vrot.lane.b32.xlu1 %v283_v57, %s2613_s5  ;;  %v284_v8 = vmul.f32 0.35355338, %v280_v6 }
 0x2c7   :  { %v342_v62 = vpop.f32.mrb[4].mxu1 }
 0x2c8   :  { %v343_v63 = vadd.f32 %v2077_v61, %v342_v62  ;;  %v2191_v2 = vpop.f32.mrb[5].mxu1 }
 0x2c9   :  { %v345_v3 = vpop.f32.mrb[6].mxu1 }
 0x2ca   :  { %749 = vrot.lane.b32.xlu1 %v343_v63, %s2614_s1  ;;  %577 = vrot.lane.b32.xlu0 %v343_v63, %s2613_s5  ;;  %v2192_v4 = vpop.f32.mrb[7].mxu1  ;;  %v346_v7 = vadd.f32 %v2077_v61, %v345_v3 }
 0x2cb   :  { %2202 = vmatpush3.xpose.msk.msra.mxu1 %vm413_vm6, %v343_v63 }
 0x2cc   :  { %2206 = vmatprep.subr.mxu1 %v2611_v16 }
 0x2ce   :  { %2204 = vmatmul.mubr.msk.f32.vlgmr.msra.gmra.mrb[8].mxu1 %vm413_vm6, %v283_v57  ;;  %747 = vrot.lane.b32.xlu1 %v283_v57, %s2614_s1 }
 0x2cf   :  { %920 = vrot.lane.b32.xlu0 %v343_v63, %s2615_s6  ;;  %2207 = vmatpush3.msra.mxu1 %v2875_v5 }
 0x2d0   :  { %2208 = vmatprep.mubr.msk.f32.mxu1 %vm2612_vm1, %v2611_v16  ;;  %2216 = vmatprep.subr.mxu1 %v2611_v16 }
 0x2d2   :  { %918 = vrot.lane.b32.xlu1 %v283_v57, %s2615_s6 }
 0x2d3   :  { %1252 = vrot.lane.b32.xlu0 %v346_v7, %s2613_s5 }
 0x2d6   :  { %1250 = vrot.lane.b32.xlu1 %v284_v8, %s2613_s5 }
 0x2d7   :  { %1423 = vrot.lane.b32.xlu0 %v346_v7, %s2614_s1 }
 0x2da   :  { %1421 = vrot.lane.b32.xlu1 %v284_v8, %s2614_s1 }
 0x2db   :  { %1593 = vrot.lane.b32.xlu0 %v346_v7, %s2615_s6 }
 0x2de   :  { %1591 = vrot.lane.b32.xlu1 %v284_v8, %s2615_s6 }
 0x336   :  { %v576_v9 = vpop.permute.xlu1 %575 }
 0x33c   :  { %v750_v10 = vpop.permute.xlu1 %749  ;;  %v578_v11 = vpop.permute.xlu0 %577 }
 0x33d   :  { %2212 = vmatpush3.xpose.msk.msra.mxu0 %vm413_vm6, %v578_v11 }
 0x33e   :  { %2221 = vmatprep.subr.mxu0 %v2611_v16 }
 0x340   :  { %v748_v12 = vpop.permute.xlu1 %747  ;;  %2214 = vmatmul.mubr.msk.f32.vlgmr.msra.gmra.mrb[4].mxu0 %vm413_vm6, %v576_v9 }
 0x341   :  { %2222 = vmatpush3.xpose.msk.msra.mxu0 %vm413_vm6, %v750_v10  ;;  %2223 = vmatprep.mubr.msk.f32.mxu0 %vm2612_vm1, %v2611_v16  ;;  %v921_v13 = vpop.permute.xlu0 %920 }
 0x342   :  { %2231 = vmatprep.subr.mxu0 %v2611_v16 }
 0x344   :  { %2224 = vmatmul.mubr.msk.f32.vlgmr.msra.gmra.mrb[6].mxu0 %vm413_vm6, %v748_v12  ;;  %v919_v14 = vpop.permute.xlu1 %918 }
 0x345   :  { %2232 = vmatpush3.xpose.msk.msra.mxu0 %vm413_vm6, %v921_v13  ;;  %2233 = vmatprep.mubr.msk.f32.mxu0 %vm2612_vm1, %v2611_v16  ;;  %v1253_v15 = vpop.permute.xlu0 %1252 }
 0x346   :  { %2241 = vmatprep.subr.mxu0 %v2611_v16 }
 0x348   :  { %2234 = vmatmul.mubr.msk.f32.vlgmr.msra.gmra.mrb[8].mxu0 %vm413_vm6, %v919_v14  ;;  %v1251_v17 = vpop.permute.xlu1 %1250 }
 0x349   :  { %2242 = vmatpush3.xpose.msk.msra.mxu0 %vm413_vm6, %v346_v7  ;;  %2243 = vmatprep.mubr.msk.f32.mxu0 %vm2612_vm1, %v2611_v16  ;;  %v1424_v18 = vpop.permute.xlu0 %1423 }
 0x34a   :  { %2251 = vmatprep.subr.mxu0 %v2611_v16 }
 0x34c   :  { %2244 = vmatmul.mubr.msk.f32.vlgmr.msra.gmra.mrb[10].mxu0 %vm413_vm6, %v284_v8  ;;  %v1422_v19 = vpop.permute.xlu1 %1421 }
 0x34d   :  { %2252 = vmatpush3.xpose.msk.msra.mxu0 %vm413_vm6, %v1253_v15  ;;  %2253 = vmatprep.mubr.msk.f32.mxu0 %vm2612_vm1, %v2611_v16  ;;  %v1594_v20 = vpop.permute.xlu0 %1593 }
 0x34e   :  { %2261 = vmatprep.subr.mxu0 %v2611_v16 }
 0x350   :  { %2254 = vmatmul.mubr.msk.f32.vlgmr.msra.gmra.mrb[12].mxu0 %vm413_vm6, %v1251_v17  ;;  %v1592_v21 = vpop.permute.xlu1 %1591 }
 0x351   :  { %2262 = vmatpush3.xpose.msk.msra.mxu0 %vm413_vm6, %v1424_v18  ;;  %2263 = vmatprep.mubr.msk.f32.mxu0 %vm2612_vm1, %v2611_v16 }
 0x352   :  { %2271 = vmatprep.subr.mxu0 %v2611_v16 }
 0x354   :  { %2264 = vmatmul.mubr.msk.f32.vlgmr.msra.gmra.mrb[14].mxu0 %vm413_vm6, %v1422_v19 }
 0x355   :  { %2272 = vmatpush3.xpose.msk.msra.mxu0 %vm413_vm6, %v1594_v20  ;;  %2273 = vmatprep.mubr.msk.f32.mxu0 %vm2612_vm1, %v2611_v16 }
 0x356   :  { %2281 = vmatprep.subr.bf16.mxu0 %v2611_v16 }
 0x358   :  { %2274 = vmatmul.mubr.msk.f32.vlgmr.msra.gmra.mrb[16].mxu0 %vm413_vm6, %v1592_v21 }
 0x359   :  { %2285 = vmatprep.mubr.msk.bf16.mxu0 %vm2612_vm1, %v2611_v16 }
 0x3a1   :  { %v486_v22 = vpop.f32.mrb[8].mxu1 }
 0x3a2   :  { %v2205_v23 = vpop.f32.mrb[9].mxu1  ;;  %v490_v24 = vsel %vm413_vm6, %v486_v22, -inf }
 0x3a3   :  { %491 = vmax.xlane.f32.xlu0 %v490_v24 }
 0x413   :  { %v649_v25 = vpop.f32.mrb[4].mxu0 }
 0x414   :  { %v2215_v26 = vpop.f32.mrb[5].mxu0  ;;  %v653_v27 = vsel %vm413_vm6, %v649_v25, -inf }
 0x415   :  { %654 = vmax.xlane.f32.xlu1 %v653_v27 }
 0x417   :  { %v821_v28 = vpop.f32.mrb[6].mxu0 }
 0x418   :  { %v2225_v29 = vpop.f32.mrb[7].mxu0  ;;  %v825_v30 = vsel %vm413_vm6, %v821_v28, -inf }
 0x419   :  { %826 = vmax.xlane.f32.xlu0 %v825_v30 }
 0x41b   :  { %v992_v31 = vpop.f32.mrb[8].mxu0 }
 0x41c   :  { %v2235_v32 = vpop.f32.mrb[9].mxu0  ;;  %v996_v33 = vsel %vm413_vm6, %v992_v31, -inf }
 0x41d   :  { %997 = vmax.xlane.f32.xlu0 %v996_v33 }
 0x41f   :  { %v1161_v34 = vpop.f32.mrb[10].mxu0 }
 0x420   :  { %v2245_v35 = vpop.f32.mrb[11].mxu0  ;;  %v1165_v36 = vsel %vm413_vm6, %v1161_v34, -inf }
 0x421   :  { %1166 = vmax.xlane.f32.xlu0 %v1165_v36 }
 0x423   :  { %v1324_v37 = vpop.f32.mrb[12].mxu0 }
 0x424   :  { %v2255_v38 = vpop.f32.mrb[13].mxu0  ;;  %v1328_v39 = vsel %vm413_vm6, %v1324_v37, -inf }
 0x425   :  { %1329 = vmax.xlane.f32.xlu1 %v1328_v39 }
 0x427   :  { %v1495_v40 = vpop.f32.mrb[14].mxu0 }
 0x428   :  { %v2265_v41 = vpop.f32.mrb[15].mxu0  ;;  %v1499_v42 = vsel %vm413_vm6, %v1495_v40, -inf }
 0x429   :  { %1500 = vmax.xlane.f32.xlu0 %v1499_v42 }
 0x42b   :  { %v1665_v43 = vpop.f32.mrb[16].mxu0 }
 0x42c   :  { %v2275_v44 = vpop.f32.mrb[17].mxu0  ;;  %v1669_v45 = vsel %vm413_vm6, %v1665_v43, -inf }
 0x42d   :  { %1670 = vmax.xlane.f32.xlu1 %v1669_v45 }
 0x430   :  { %v492_v46 = vpop.xlane.xlu0 %491 }
 0x431   :  { %v493_v47 = vsub.f32 %v486_v22, %v492_v46 }
 0x433   :  { %v494_v48 = vmul.f32 1.442695, %v493_v47 }
 0x435   :  { %2351 = vpow2.f32 %v494_v48 }
 0x43f   :  { %v2352_v49 = vpop.eup %2351 }
 0x440   :  { %v496_v50 = vsel %vm413_vm6, %v2352_v49, 0.0 }
 0x441   :  { %497 = vadd.xlane.f32.xlu0 %v496_v50 }
 0x4a2   :  { %v655_v51 = vpop.xlane.xlu1 %654 }
 0x4a3   :  { %v656_v52 = vsub.f32 %v649_v25, %v655_v51 }
 0x4a5   :  { %v657_v53 = vmul.f32 1.442695, %v656_v52 }
 0x4a6   :  { %v827_v54 = vpop.xlane.xlu0 %826 }
 0x4a7   :  { %2353 = vpow2.f32 %v657_v53  ;;  %v828_v55 = vsub.f32 %v821_v28, %v827_v54 }
 0x4a9   :  { %v829_v56 = vmul.f32 1.442695, %v828_v55 }
 0x4aa   :  { %v998_v62 = vpop.xlane.xlu0 %997 }
 0x4ab   :  { %2355 = vpow2.f32 %v829_v56  ;;  %v999_v7 = vsub.f32 %v992_v31, %v998_v62 }
 0x4ad   :  { %v1000_v12 = vmul.f32 1.442695, %v999_v7 }
 0x4ae   :  { %v1167_v63 = vpop.xlane.xlu0 %1166 }
 0x4af   :  { %v1168_v4 = vsub.f32 %v1161_v34, %v1167_v63 }
 0x4b1   :  { %v2354_v57 = vpop.eup %2353  ;;  %v1169_v8 = vmul.f32 1.442695, %v1168_v4 }
 0x4b2   :  { %v659_v59 = vsel %vm413_vm6, %v2354_v57, 0.0  ;;  %v1330_v11 = vpop.xlane.xlu1 %1329 }
 0x4b3   :  { %660 = vadd.xlane.f32.xlu1 %v659_v59  ;;  %v1331_v13 = vsub.f32 %v1324_v37, %v1330_v11 }
 0x4b5   :  { %v2936_v60 = vpop.eup %2355 }
 0x4b6   :  { %v831_v61 = vsel %vm413_vm6, %v2936_v60, 0.0  ;;  %v1501_v2 = vpop.xlane.xlu0 %1500 }
 0x4b7   :  { %832 = vadd.xlane.f32.xlu0 %v831_v61  ;;  %v1502_v9 = vsub.f32 %v1495_v40, %v1501_v2 }
 0x4b9   :  { %v1503_v14 = vmul.f32 1.442695, %v1502_v9 }
 0x4ba   :  { %v1671_v15 = vpop.xlane.xlu1 %1670 }
 0x4bb   :  { %v1672_v17 = vsub.f32 %v1665_v43, %v1671_v15 }
 0x4bd   :  { %v1673_v18 = vmul.f32 1.442695, %v1672_v17 }
 0x4c4   :  { %836 = vrot.lane.b32.xlu1 %v2875_v5, %s2614_s1 }
 0x4c8   :  { %1007 = vrot.lane.b32.xlu1 %v2875_v5, %s2615_s6 }
 0x4cc   :  { %1340 = vrot.lane.b32.xlu1 %v2868_v58, %s2613_s5 }
 0x4cd   :  { %665 = vrot.lane.b32.xlu0 %v2875_v5, %s2613_s5  ;;  %v1332_v5 = vmul.f32 1.442695, %v1331_v13 }
 0x4ce   :  { %v498_v3 = vpop.xlane.xlu0 %497 }
 0x4cf   :  { %2357 = vrcp.f32 %v498_v3  ;;  %v2335_v3 = vld [vmem:[%s3082_s9] sm:$0xff]  }
 0x4d0   :  { %2359 = vpow2.f32 %v1169_v8  ;;  %2282 = vmatpush3.bf16.msra.mxu0 %v2335_v3 }
 0x4d1   :  { %2361 = vpow2.f32 %v1000_v12  ;;  %2283 = vmatprep.subr.bf16.mxu0 %v2611_v16 }
 0x4d2   :  { %2363 = vpow2.f32 %v1503_v14 }
 0x4d3   :  { %2365 = vpow2.f32 %v1332_v5 }
 0x4d4   :  { %2367 = vpow2.f32 %v1673_v18 }
 0x4d9   :  { %v2358_v6 = vpop.eup %2357 }
 0x4da   :  { %v500_v10 = vmul.f32 %v2358_v6, %v2352_v49  ;;  %v2360_v19 = vpop.eup %2359  ;;  %v2336_v6 = vld [vmem:[%s3082_s9 + $0x8] sm:$0xff]  }
 0x4db   :  { %v2362_v20 = vpop.eup %2361  ;;  %v1171_v21 = vsel %vm413_vm6, %v2360_v19, 0.0  ;;  %2284 = vmatpush3.bf16.msra.mxu0 %v2336_v6  ;;  %v2114_v6 = vld [vmem:[#allocation15] ss:$0 sm:$0xff] }
 0x4dc   :  { %2209 = vmatmul.mubr.msk.f32.vlgmr.msra.gmra.mrb[10].mxu1 %vm413_vm6, %v500_v10  ;;  %v2952_v22 = vpop.eup %2363  ;;  %v1002_v23 = vsel %vm413_vm6, %v2362_v20, 0.0  ;;  %2297 = vmatprep.subr.bf16.mxu0 %v2611_v16 }
 0x4dd   :  { %2218 = vmatprep.mubr.msk.f32.mxu1 %vm2612_vm1, %v2611_v16  ;;  %v1505_v24 = vsel %vm413_vm6, %v2952_v22, 0.0  ;;  %v2366_v25 = vpop.eup %2365 }
 0x4de   :  { %v1334_v26 = vsel %vm413_vm6, %v2366_v25, 0.0  ;;  %v2958_v27 = vpop.eup %2367 }
 0x4df   :  { %v1675_v28 = vsel %vm413_vm6, %v2958_v27, 0.0 }
 0x4ec   :  { %1172 = vadd.xlane.f32.xlu0 %v1171_v21 }
 0x4f0   :  { %1003 = vadd.xlane.f32.xlu1 %v1002_v23  ;;  %1506 = vadd.xlane.f32.xlu0 %v1505_v24 }
 0x4f4   :  { %1335 = vadd.xlane.f32.xlu1 %v1334_v26 }
 0x4f8   :  { %1676 = vadd.xlane.f32.xlu1 %v1675_v28 }
 0x506   :  { %1510 = vrot.lane.b32.xlu0 %v2868_v58, %s2614_s1 }
 0x509   :  { %1680 = vrot.lane.b32.xlu1 %v2868_v58, %s2615_s6 }
 0x540   :  { %v661_v29 = vpop.xlane.xlu1 %660 }
 0x541   :  { %2369 = vrcp.f32 %v661_v29 }
 0x544   :  { %v833_v30 = vpop.xlane.xlu0 %832  ;;  %v837_v34 = vpop.permute.xlu1 %836 }
 0x545   :  { %2371 = vrcp.f32 %v833_v30 }
 0x548   :  { %v666_v31 = vpop.permute.xlu0 %665  ;;  %v1008_v37 = vpop.permute.xlu1 %1007 }
 0x549   :  { %2217 = vmatpush3.msra.mxu1 %v666_v31 }
 0x54a   :  { %2226 = vmatprep.subr.mxu1 %v2611_v16 }
 0x54b   :  { %v2370_v32 = vpop.eup %2369 }
 0x54c   :  { %v663_v33 = vmul.f32 %v2370_v32, %v2354_v57  ;;  %v1341_v38 = vpop.permute.xlu1 %1340 }
 0x54e   :  { %2219 = vmatmul.mubr.msk.f32.vlgmr.msra.gmra.mrb[12].mxu1 %vm413_vm6, %v663_v33 }
 0x54f   :  { %v2372_v35 = vpop.eup %2371  ;;  %2227 = vmatpush3.msra.mxu1 %v837_v34  ;;  %2228 = vmatprep.mubr.msk.f32.mxu1 %vm2612_vm1, %v2611_v16 }
 0x550   :  { %v835_v36 = vmul.f32 %v2372_v35, %v2936_v60  ;;  %2236 = vmatprep.subr.mxu1 %v2611_v16 }
 0x552   :  { %2229 = vmatmul.mubr.msk.f32.vlgmr.msra.gmra.mrb[14].mxu1 %vm413_vm6, %v835_v36 }
 0x553   :  { %2237 = vmatpush3.msra.mxu1 %v1008_v37  ;;  %2238 = vmatprep.mubr.msk.f32.mxu1 %vm2612_vm1, %v2611_v16 }
 0x554   :  { %2246 = vmatprep.subr.mxu1 %v2611_v16 }
 0x579   :  { %v1173_v39 = vpop.xlane.xlu0 %1172 }
 0x57d   :  { %v1004_v40 = vpop.xlane.xlu1 %1003  ;;  %v1507_v42 = vpop.xlane.xlu0 %1506 }
 0x57e   :  { %2373 = vrcp.f32 %v1004_v40 }
 0x57f   :  { %2375 = vrcp.f32 %v1173_v39 }
 0x581   :  { %v1336_v41 = vpop.xlane.xlu1 %1335  ;;  %v1511_v51 = vpop.permute.xlu0 %1510 }
 0x582   :  { %2377 = vrcp.f32 %v1336_v41  ;;  %v2337_v41 = vld [vmem:[%s3086_s13] sm:$0xff]  }
 0x583   :  { %2379 = vrcp.f32 %v1507_v42  ;;  %v2338_v42 = vld [vmem:[%s3086_s13 + $0x8] sm:$0xff]  }
 0x585   :  { %v1677_v45 = vpop.xlane.xlu1 %1676 }
 0x586   :  { %2381 = vrcp.f32 %v1677_v45 }
 0x588   :  { %v2374_v43 = vpop.eup %2373 }
 0x589   :  { %v1006_v44 = vmul.f32 %v2374_v43, %v2362_v20  ;;  %v2376_v46 = vpop.eup %2375  ;;  %v1681_v53 = vpop.permute.xlu1 %1680  ;;  %v2339_v43 = vld [vmem:[%s3088_s15] sm:$0xff]  }
 0x58a   :  { %v1175_v47 = vmul.f32 %v2376_v46, %v2360_v19 }
 0x58b   :  { %2239 = vmatmul.mubr.msk.f32.vlgmr.msra.gmra.mrb[16].mxu1 %vm413_vm6, %v1006_v44  ;;  %v2340_v44 = vld [vmem:[%s3088_s15 + $0x8] sm:$0xff]  }
 0x58c   :  { %2247 = vmatpush3.msra.mxu1 %v2868_v58  ;;  %2248 = vmatprep.mubr.msk.f32.mxu1 %vm2612_vm1, %v2611_v16  ;;  %v2378_v48 = vpop.eup %2377 }
 0x58d   :  { %2256 = vmatprep.subr.mxu1 %v2611_v16  ;;  %v1338_v49 = vmul.f32 %v2378_v48, %v2366_v25  ;;  %v2380_v50 = vpop.eup %2379 }
 0x58e   :  { %v1509_v58 = vmul.f32 %v2380_v50, %v2952_v22  ;;  %v2109_v22 = vld [vmem:[#allocation12] ss:$0 sm:$0xff] }
 0x58f   :  { %2249 = vmatmul.mubr.msk.f32.vlgmr.msra.gmra.mrb[18].mxu1 %vm413_vm6, %v1175_v47 }
 0x590   :  { %2257 = vmatpush3.msra.mxu1 %v1341_v38  ;;  %2258 = vmatprep.mubr.msk.f32.mxu1 %vm2612_vm1, %v2611_v16  ;;  %v2382_v52 = vpop.eup %2381 }
 0x591   :  { %2266 = vmatprep.subr.mxu1 %v2611_v16  ;;  %v1679_v54 = vmul.f32 %v2382_v52, %v2958_v27 }
 0x593   :  { %2259 = vmatmul.mubr.msk.f32.vlgmr.msra.gmra.mrb[20].mxu1 %vm413_vm6, %v1338_v49 }
 0x594   :  { %2267 = vmatpush3.msra.mxu1 %v1511_v51  ;;  %2268 = vmatprep.mubr.msk.f32.mxu1 %vm2612_vm1, %v2611_v16 }
 0x595   :  { %2276 = vmatprep.subr.mxu1 %v2611_v16 }
 0x597   :  { %2269 = vmatmul.mubr.msk.f32.vlgmr.msra.gmra.mrb[22].mxu1 %vm413_vm6, %v1509_v58 }
 0x598   :  { %2277 = vmatpush3.msra.mxu1 %v1681_v53  ;;  %2278 = vmatprep.mubr.msk.f32.mxu1 %vm2612_vm1, %v2611_v16 }
 0x599   :  { %2289 = vmatprep.subr.bf16.mxu1 %v2611_v16 }
 0x59b   :  { %2279 = vmatmul.mubr.msk.f32.vlgmr.msra.gmra.mrb[24].mxu1 %vm413_vm6, %v1679_v54 }
 0x59c   :  { %2293 = vmatprep.mubr.msk.bf16.mxu1 %vm2612_vm1, %v2611_v16  ;;  %2290 = vmatpush3.bf16.msra.mxu1 %v2337_v41 }
 0x59d   :  { %2291 = vmatprep.subr.bf16.mxu1 %v2611_v16 }
 0x5a0   :  { %2292 = vmatpush3.bf16.msra.mxu1 %v2338_v42 }
 0x5af   :  { %v570_v55 = vpop.f32.mrb[10].mxu1 }
 0x5b0   :  { %574 = vst.msk [vmem:[#allocation2] sm:$0xff] %vm413_vm6, %v570_v55  ;;  %v2210_v56 = vpop.f32.mrb[11].mxu1 }
 0x621   :  { %v737_v57 = vpop.f32.mrb[12].mxu1 }
 0x622   :  { %742 = vrot.lane.b32.xlu0 %v737_v57, %s2616_s19  ;;  %v2220_v59 = vpop.f32.mrb[13].mxu1 }
 0x625   :  { %v908_v60 = vpop.f32.mrb[14].mxu1 }
 0x626   :  { %913 = vrot.lane.b32.xlu0 %v908_v60, %s2617_s20  ;;  %v2230_v61 = vpop.f32.mrb[15].mxu1 }
 0x627   :  { %v2113_v61 = vld [vmem:[#allocation14] ss:$0 sm:$0xff] }
 0x65e   :  { %v1079_v62 = vpop.f32.mrb[16].mxu1 }
 0x65f   :  { %1084 = vrot.lane.b32.xlu0 %v1079_v62, %s2618_s23  ;;  %v2240_v63 = vpop.f32.mrb[17].mxu1 }
 0x662   :  { %v1245_v2 = vpop.f32.mrb[18].mxu1 }
 0x663   :  { %1249 = vst.msk [vmem:[#allocation2 + $0x8] sm:$0xff] %vm413_vm6, %v1245_v2  ;;  %v2250_v4 = vpop.f32.mrb[19].mxu1 }
 0x666   :  { %v1412_v7 = vpop.f32.mrb[20].mxu1 }
 0x667   :  { %1417 = vrot.lane.b32.xlu1 %v1412_v7, %s2616_s19  ;;  %v2260_v8 = vpop.f32.mrb[21].mxu1 }
 0x66a   :  { %v1582_v9 = vpop.f32.mrb[22].mxu1 }
 0x66b   :  { %1587 = vrot.lane.b32.xlu1 %v1582_v9, %s2617_s20  ;;  %v2270_v10 = vpop.f32.mrb[23].mxu1 }
 0x66e   :  { %v1752_v11 = vpop.f32.mrb[24].mxu1 }
 0x66f   :  { %1757 = vrot.lane.b32.xlu1 %v1752_v11, %s2618_s23  ;;  %v2280_v12 = vpop.f32.mrb[25].mxu1  ;;  %v2341_v11 = vld [vmem:[%s3088_s15 + $0x10] sm:$0xff]  }
 0x670   :  { %v2342_v12 = vld [vmem:[%s3088_s15 + $0x18] sm:$0xff]  }
 0x694   :  { %v743_v13 = vpop.permute.xlu0 %742 }
 0x695   :  { %746 = vst.msk [vmem:[#allocation2] sm:$0xff] %vm745_vm7, %v743_v13  ;;  %v2115_v13 = vld [vmem:[%s3087_s14] ss:$0 sm:$0xff]  ;;  %s2619_s14 = smov [#allocation17]  }
 0x696   :  { %s2055_s15 = sshll.u32 %s2619_s14, 4  ;;  %s2056_s15 = int_to_ptr.vmem [resolvable:$true] %s2055_s15 }
 0x697   :  { %s2567_s25 = scalar_lea.vmem %s2056_s15, 256  ;;  %p2572_p9 = scmp.lt.s32.totalorder %s2056_s15, %s2056_s15 }
 0x698   :  { %v914_v14 = vpop.permute.xlu0 %913  ;;  %p2568_p8 = scmp.ne.s32.totalorder %s2056_s15, %s2567_s25  ;;  %p2573_p10 = scmp.lt.s32.totalorder %s2567_s25, %s2567_s25 }
 0x699   :  { %917 = vst.msk [vmem:[#allocation2] sm:$0xff] %vm916_vm8, %v914_v14 }
 0x69a   :  { %p2574_p11 = por %p2573_p10, %p2572_p9 }
 0x69c   :  { %p2575_p12 = pnand %p2574_p11, %p2568_p8 }
 0x6d1   :  { %v1085_v15 = vpop.permute.xlu0 %1084 }
 0x6d2   :  { %1088 = vst.msk [vmem:[#allocation2] sm:$0xff] %vm1087_vm9, %v1085_v15 }
 0x6d9   :  { %v1418_v5 = vpop.permute.xlu1 %1417  ;;  %v1761_v19 = vld [vmem:[#allocation2] sm:$0xff] }
 0x6da   :  { %1420 = vst.msk [vmem:[#allocation2 + $0x8] sm:$0xff] %vm745_vm7, %v1418_v5 }
 0x6dd   :  { %v1588_v17 = vpop.permute.xlu1 %1587 }
 0x6de   :  { %1590 = vst.msk [vmem:[#allocation2 + $0x8] sm:$0xff] %vm916_vm8, %v1588_v17 }
 0x6e1   :  { %v1758_v18 = vpop.permute.xlu1 %1757 }
 0x6e2   :  { %1760 = vst.msk [vmem:[#allocation2 + $0x8] sm:$0xff] %vm1087_vm9, %v1758_v18 }
 0x6e9   :  { %v1762_v20 = vld [vmem:[#allocation2 + $0x8] sm:$0xff] }
 0x6ea   :  { %v1763_v21 = vpack.c.bf16 %v1762_v20, %v1761_v19 }
 0x6ec   :  { %2286 = vmatmul.mubr.msk.bf16.vlgmr.msra.gmra.mrb[20].mxu0 %vm157_vm0, %v1763_v21 }
 0x6ed   :  { %2305 = vmatprep.mubr.msk.bf16.mxu0 %vm2612_vm1, %v2611_v16  ;;  %2298 = vmatpush3.bf16.msra.mxu0 %v2339_v43 }
 0x6ee   :  { %2299 = vmatprep.subr.bf16.mxu0 %v2611_v16 }
 0x6f1   :  { %2300 = vmatpush3.bf16.msra.mxu0 %v2340_v44 }
 0x6f2   :  { %2301 = vmatprep.subr.bf16.mxu0 %v2611_v16 }
 0x6f5   :  { %2302 = vmatpush3.bf16.msra.mxu0 %v2341_v11 }
 0x6f6   :  { %2303 = vmatprep.subr.bf16.mxu0 %v2611_v16  ;;  %v2119_v16 = vld [vmem:[%s3089_s16] ss:$0 sm:$0xff] }
 0x6f9   :  { %2304 = vmatpush3.bf16.msra.mxu0 %v2342_v12 }
 0x7bf   :  { %v1824_v23 = vpop.f32.mrb[20].mxu0 }
 0x7c0   :  { %v1825_v24 = vadd.f32 %v2109_v22, %v1824_v23  ;;  %v2287_v25 = vpop.f32.mrb[21].mxu0 }
 0x7c1   :  { %v1827_v26 = vpop.f32.mrb[22].mxu0 }
 0x7c2   :  { %v3014_v27 = vadd.f32 %v1825_v24, %v2817_v0  ;;  %v1828_v28 = vadd.f32 %v2109_v22, %v1827_v26  ;;  %v2288_v29 = vpop.f32.mrb[23].mxu0 }
 0x7c4   :  { %v3017_v30 = vadd.f32 %v1828_v28, %v2822_v1  ;;  %v1835_v31 = vsel %vm157_vm0, %v3014_v27, 0.0 }
 0x7c5   :  { %1836 = vadd.xlane.f32.xlu0 %v1835_v31 }
 0x7c6   :  { %v1838_v32 = vsel %vm157_vm0, %v3017_v30, 0.0 }
 0x7c7   :  { %1839 = vadd.xlane.f32.xlu1 %v1838_v32 }
 0x852   :  { %v1837_v33 = vpop.xlane.xlu0 %1836 }
 0x853   :  { %v1841_v34 = vmul.f32 0.03125, %v1837_v33 }
 0x854   :  { %v1840_v35 = vpop.xlane.xlu1 %1839 }
 0x855   :  { %v1843_v36 = vsub.f32 %v3014_v27, %v1841_v34  ;;  %v1842_v0 = vmul.f32 0.03125, %v1840_v35 }
 0x857   :  { %v1844_v37 = vsub.f32 %v3017_v30, %v1842_v0  ;;  %v1845_v38 = vmul.f32 %v1843_v36, %v1843_v36  ;;  %v1879_v63 = vmul.f32 %v2113_v61, %v1843_v36 }
 0x859   :  { %v1847_v1 = vsel %vm157_vm0, %v1845_v38, 0.0  ;;  %v1846_v39 = vmul.f32 %v1844_v37, %v1844_v37  ;;  %v1880_v2 = vmul.f32 %v2113_v61, %v1844_v37 }
 0x85a   :  { %1848 = vadd.xlane.f32.xlu0 %v1847_v1 }
 0x85b   :  { %v1850_v40 = vsel %vm157_vm0, %v1846_v39, 0.0 }
 0x85e   :  { %1851 = vadd.xlane.f32.xlu0 %v1850_v40 }
 0x8e7   :  { %v1849_v45 = vpop.xlane.xlu0 %1848 }
 0x8e8   :  { %v1853_v46 = vmul.f32 0.032258064, %v1849_v45 }
 0x8ea   :  { %2383 = vrsqrt.f32 %v1853_v46  ;;  %vm1857_vm10 = vcmp.eq.f32.partialorder %v1853_v46, inf  ;;  %v1860_v51 = vand.u32 2147483648, %v1853_v46  ;;  %vm1859_vm11 = vcmp.eq.f32.partialorder %v1853_v46, 0.0 }
 0x8eb   :  { %v1852_v47 = vpop.xlane.xlu0 %1851 }
 0x8ec   :  { %v1854_v48 = vmul.f32 0.032258064, %v1852_v47 }
 0x8ee   :  { %2385 = vrsqrt.f32 %v1854_v48  ;;  %vm1864_vm12 = vcmp.eq.f32.partialorder %v1854_v48, inf  ;;  %v1867_v56 = vand.u32 2147483648, %v1854_v48  ;;  %vm1866_vm13 = vcmp.eq.f32.partialorder %v1854_v48, 0.0 }
 0x8f4   :  { %v2384_v49 = vpop.eup %2383 }
 0x8f5   :  { %v1856_v50 = vmul.f32 %v2384_v49, %v1853_v46 }
 0x8f7   :  { %v1858_v58 = vsel %vm1857_vm10, %v1853_v46, %v1856_v50 }
 0x8f8   :  { %v2386_v52 = vpop.eup %2385  ;;  %v1861_v53 = vsel %vm1859_vm11, %v1860_v51, %v1858_v58 }
 0x8f9   :  { %v1869_v54 = vadd.f32 1000000.0, %v1861_v53  ;;  %v1863_v55 = vmul.f32 %v2386_v52, %v1854_v48 }
 0x8fb   :  { %2387 = vrcp.f32 %v1869_v54  ;;  %v1865_v57 = vsel %vm1864_vm12, %v1854_v48, %v1863_v55 }
 0x8fc   :  { %v1868_v59 = vsel %vm1866_vm13, %v1867_v56, %v1865_v57 }
 0x8fd   :  { %v1870_v60 = vadd.f32 1000000.0, %v1868_v59 }
 0x8ff   :  { %2389 = vrcp.f32 %v1870_v60 }
 0x905   :  { %v2388_v62 = vpop.eup %2387 }
 0x906   :  { %v1881_v3 = vmul.f32 %v2388_v62, %v1879_v63 }
 0x908   :  { %v1889_v8 = vadd.f32 %v2114_v6, %v1881_v3 }
 0x909   :  { %v2390_v4 = vpop.eup %2389 }
 0x90a   :  { %v1882_v7 = vmul.f32 %v2390_v4, %v1880_v2 }
 0x90c   :  { %v1890_v9 = vadd.f32 %v2114_v6, %v1882_v7 }
 0x90e   :  { %v1891_v10 = vpack.c.bf16 %v1890_v9, %v1889_v8 }
 0x910   :  { %2294 = vmatmul.mubr.msk.bf16.vlgmr.msra.gmra.mrb[28].mxu1 %vm157_vm0, %v1891_v10 }
 0x9e3   :  { %v1952_v14 = vpop.f32.mrb[28].mxu1 }
 0x9e4   :  { %v1953_v15 = vadd.f32 %v2115_v13, %v1952_v14  ;;  %v2295_v5 = vpop.f32.mrb[29].mxu1 }
 0x9e5   :  { %v1955_v17 = vpop.f32.mrb[30].mxu1 }
 0x9e6   :  { %v1956_v18 = vadd.f32 %v2115_v13, %v1955_v17  ;;  %v2296_v19 = vpop.f32.mrb[31].mxu1  ;;  %v1959_v20 = vmax.f32 %v1953_v15, 0.0 }
 0x9e8   :  { %v1960_v21 = vmax.f32 %v1956_v18, 0.0 }
 0x9ea   :  { %v1961_v22 = vpack.c.bf16 %v1960_v21, %v1959_v20 }
 0x9ec   :  { %2306 = vmatmul.mubr.msk.bf16.vlgmr.msra.gmra.mrb[24].mxu0 %vm2001_vm14, %v1961_v22 }
 0xabf   :  { %v2039_v23 = vpop.f32.mrb[24].mxu0 }
 0xac0   :  { %v2040_v24 = vadd.f32 %v2119_v16, %v2039_v23  ;;  %v2307_v25 = vpop.f32.mrb[25].mxu0 }
 0xac1   :  { %v2042_v26 = vpop.f32.mrb[26].mxu0 }
 0xac2   :  { %v2046_v28 = vadd.f32 %v2040_v24, %v3014_v27  ;;  %v2043_v29 = vadd.f32 %v2119_v16, %v2042_v26  ;;  %v2308_v31 = vpop.f32.mrb[27].mxu0 }
 0xac4   :  { %2048 = vst.msk [vmem:[#allocation17] sm:$0xff] %vm157_vm0, %v2046_v28  ;;  %v2047_v32 = vadd.f32 %v2043_v29, %v3017_v30 }
 0xac6   :  { %2049 = vst.msk [vmem:[#allocation17 + $0x8] sm:$0xff] %vm157_vm0, %v2047_v32 }
 0xac7   :  { %2578 = shalt.err (!%p2575_p12)
}
 0xac8   :  { %s2579_s1 = scalar_lea.hbm %s3090_s17, 256 }
 0xac9   :  { %p2580_p13 = scmp.ne.s32.totalorder %s3090_s17, %s2579_s1  ;;  %p2583_p0 = scmp.lt.u32.totalorder %s2579_s1, %s3090_s17 }
 0xacb   :  { %p2585_p1 = pnand %p2583_p0, %p2580_p13 }
 0xacd   :  { %2588 = shalt.err (!%p2585_p1)
}
 0xace   :  { %s2620_s11 = smov 128  }
 0xacf   :  { %2061 = dma.vmem_to_hbm [thread:$0]  %s2056_s15, 256, %s3090_s17, [#allocation5], %s2620_s11, %s2620_s11, %s2616_s19  }
 0xad0   :  { %2599 = dma.done.wait [#allocation5], 256  }
 0xad1   :  { %2600 = vsyncadd [#allocation5], 4294967040 }
 0xad2   :  { %2065 = vsyncpa [#allocation4], 1 }
 0xad3   :  { %2066 = vsyncpa [#allocation7], 1 }
 0xad4   :  { %2067 = vsyncpa [#allocation10], 1 }
 0xad5   :  { %2068 = vsyncpa [#allocation13], 1 }
 0xad6   :  { %2069 = vsyncpa [#allocation16], 1 }
 0xad7   :  { %2070 = vsyncpa [#allocation5], 1 }

</bundles_post_ra>
